<compile_context>
chip_gen: v7x
topology: tpu7x:2x2x1
jax: 0.10.0
libtpu: 0.0.40
codegen_flags: <defaults>
</compile_context>

<pallas_src>
import functools

import jax
import jax.numpy as jnp
from jax import lax
from jax.experimental import pallas as pl
from jax.experimental.pallas import tpu as pltpu

KS = 7    # spatial-attention conv kernel size
PAD = 3   # spatial-attention conv padding


def cbam_kernel(x_ref, w1t_ref, w2_ref, wc_ref, bc_ref, o_ref, fpad_ref, *, W):
    # x_ref    : (1, C, HW)   VMEM  lane-dense input tile (one batch element)
    # w1t_ref  : (C, CH)      VMEM  first 1x1-conv weight, pre-transposed
    # w2_ref   : (C, CH)      VMEM  second 1x1-conv weight (native layout)
    # wc_ref   : (2*KS*KS,)   SMEM  flattened 7x7 conv weight (OIHW, O=1, I=2)
    # bc_ref   : (1,)         SMEM  7x7 conv bias
    # o_ref    : (1, C, HW)   VMEM  output tile
    # fpad_ref : (2, FP)      VMEM  zero-bordered flat avg/max spatial maps
    f32 = jnp.float32
    x = x_ref[0].astype(f32)                        # (C, HW) lane-dense
    C, HW = x.shape
    OFF = PAD * W + PAD                             # flat border width

    # ---------------- channel attention: exact-f32 VPU MLP ---------------------
    # (no MXU round trip, no VMEM stats scratch — review items 3/5/10)
    avg_c = jnp.mean(x, axis=1, keepdims=True)      # (C, 1) lane reduce
    max_c = jnp.max(x, axis=1, keepdims=True)       # (C, 1) lane reduce
    w1t = w1t_ref[...].astype(f32)                  # (C, CH)
    w2 = w2_ref[...].astype(f32)                    # (C, CH)
    h_a = jnp.maximum(jnp.sum(w1t * avg_c, axis=0, keepdims=True), 0.0)   # (1, CH)
    h_m = jnp.maximum(jnp.sum(w1t * max_c, axis=0, keepdims=True), 0.0)   # (1, CH)
    # second layer is linear & bias-free, so mlp(avg) + mlp(max) = w2 @ (h_a + h_m)
    y = jnp.sum(w2 * (h_a + h_m), axis=1, keepdims=True)                  # (C, 1)
    ca = jax.nn.sigmoid(y)                                                # (C, 1)

    # ---------------- spatial avg/max maps (transient product) -----------------
    # x*ca is NOT kept live across the conv; the output is re-formed at the end
    # as x * ca * sa (review item 2).
    xca = x * ca                                    # (C, HW)  dies right below
    avg_s = jnp.mean(xca, axis=0, keepdims=True)    # (1, HW)  sublane reduce
    max_s = jnp.max(xca, axis=0, keepdims=True)     # (1, HW)  sublane reduce

    # ---------------- 7x7 spatial conv on the flat maps ------------------------
    # Zero the tiny slab (borders act as the conv's zero padding), then write the
    # interior with two lane-dense stores.  Out-of-row reads land in the zero
    # border; cross-row lane wrap is killed by the per-dj column mask.
    fpad_ref[...] = jnp.zeros(fpad_ref.shape, f32)
    fpad_ref[0:1, pl.ds(OFF, HW)] = avg_s
    fpad_ref[1:2, pl.ds(OFF, HW)] = max_s

    lane = lax.broadcasted_iota(jnp.int32, (1, HW), 1)
    col = (lane & (W - 1)) if (W & (W - 1)) == 0 else (lane % W)
    col_ok = [(col + (dj - PAD) >= 0) & (col + (dj - PAD) < W)
              for dj in range(KS)]                  # 7 masks, one per dj offset

    acc = jnp.full((1, HW), bc_ref[0], f32)
    for dj in range(KS):
        inner = jnp.zeros((1, HW), f32)
        for di in range(KS):
            start = OFF + (di - PAD) * W + (dj - PAD)   # always >= 0 by construction
            wa = wc_ref[di * KS + dj]                   # channel 0 (avg) tap weight
            wm = wc_ref[KS * KS + di * KS + dj]         # channel 1 (max) tap weight
            inner = (inner
                     + wa * fpad_ref[0:1, pl.ds(start, HW)]
                     + wm * fpad_ref[1:2, pl.ds(start, HW)])
        if dj == PAD:                               # zero column shift: always valid
            acc = acc + inner
        else:
            acc = acc + jnp.where(col_ok[dj], inner, 0.0)
    sa = jax.nn.sigmoid(acc)                        # (1, HW)

    # ---------------- single lane-dense output pass -----------------------------
    # Re-read the (VMEM-resident) input block so the f32 copy of x need not stay
    # live in vregs across the conv at larger shapes.
    o_ref[0] = (x_ref[0].astype(f32) * ca * sa).astype(o_ref.dtype)


def _cbam_call(x2, w1t, w2, wflat, bflat, *, W):
    B, C, HW = x2.shape
    CH = w1t.shape[1]
    OFF = PAD * W + PAD
    FP = HW + 2 * OFF
    kernel = functools.partial(cbam_kernel, W=W)
    return pl.pallas_call(
        kernel,
        out_shape=jax.ShapeDtypeStruct((B, C, HW), x2.dtype),
        # One batch element per grid step; "parallel" lets multi-TensorCore
        # parts split the batch.  At toy shapes this is launch/latency bound
        # (review item 10) — fine for the demo.
        grid=(B,),
        in_specs=[
            pl.BlockSpec((1, C, HW), lambda b: (b, 0, 0)),
            pl.BlockSpec((C, CH), lambda b: (0, 0)),
            pl.BlockSpec((C, CH), lambda b: (0, 0)),
            pl.BlockSpec(memory_space=pltpu.MemorySpace.SMEM),
            pl.BlockSpec(memory_space=pltpu.MemorySpace.SMEM),
        ],
        out_specs=pl.BlockSpec((1, C, HW), lambda b: (b, 0, 0)),
        scratch_shapes=[pltpu.VMEM((2, FP), jnp.float32)],   # flat padded maps
        compiler_params=pltpu.CompilerParams(
            dimension_semantics=("parallel",)),
    )(x2, w1t, w2, wflat, bflat)


@jax.jit
def cbam_pallas(x, w1, w2, wconv, bconv):
    B, C, H, W = x.shape
    x2 = x.reshape(B, C, H * W)                       # free contiguous-dim merge
    w1t = jnp.asarray(w1, jnp.float32).T              # (C, CH)
    w2f = jnp.asarray(w2, jnp.float32)                # (C, CH)
    wflat = wconv.reshape(-1).astype(jnp.float32)     # (2*KS*KS,)
    bflat = bconv.reshape(-1).astype(jnp.float32)     # (1,)
    out2 = _cbam_call(x2, w1t, w2f, wflat, bflat, W=W)
    return out2.reshape(B, C, H, W)


def cbam_reference(x, w1, w2, wconv, bconv):
    """Pure-JAX reference matching the PyTorch CBAM forward."""
    hp = lax.Precision.HIGHEST
    avg = x.mean(axis=(2, 3))                         # (B, C)
    mx = x.max(axis=(2, 3))                           # (B, C)

    def mlp(v):
        h = jnp.maximum(jnp.matmul(v, w1.T, precision=hp), 0.0)
        return jnp.matmul(h, w2.T, precision=hp)

    ca = jax.nn.sigmoid(mlp(avg) + mlp(mx))[:, :, None, None]
    out1 = ca * x

    avg_s = out1.mean(axis=1, keepdims=True)
    max_s = out1.max(axis=1, keepdims=True)
    sin = jnp.concatenate([avg_s, max_s], axis=1)     # (B, 2, H, W)
    conv = lax.conv_general_dilated(
        sin, wconv, window_strides=(1, 1),
        padding=((PAD, PAD), (PAD, PAD)),
        dimension_numbers=("NCHW", "OIHW", "NCHW"),
        precision=hp,
    ) + bconv.reshape(1, 1, 1, 1)
    sa = jax.nn.sigmoid(conv)
    return sa * out1


if __name__ == "__main__":
    B, C, H, W = 2, 32, 16, 16
    RATIO = 16
    CH = C // RATIO

    key = jax.random.PRNGKey(0)
    kx, k1, k2, k3, k4 = jax.random.split(key, 5)

    x = jax.random.normal(kx, (B, C, H, W), jnp.float32)
    # shapes follow the module __init__ (Conv2d weights with 1x1 / 7x7 kernels)
    w1 = jax.random.normal(k1, (CH, C), jnp.float32) * 0.2        # Conv2d(C, C//16, 1, bias=False)
    w2 = jax.random.normal(k2, (C, CH), jnp.float32) * 0.2        # Conv2d(C//16, C, 1, bias=False)
    wconv = jax.random.normal(k3, (1, 2, KS, KS), jnp.float32) * 0.2  # Conv2d(2, 1, 7, padding=3)
    bconv = jax.random.normal(k4, (1,), jnp.float32) * 0.2

    out = jax.block_until_ready(cbam_pallas(x, w1, w2, wconv, bconv))
    ref = jax.block_until_ready(cbam_reference(x, w1, w2, wconv, bconv))

    assert out.shape == (B, C, H, W)
    err = float(jnp.max(jnp.abs(out - ref)))
    assert bool(jnp.allclose(out, ref, rtol=5e-4, atol=5e-4)), f"max abs err = {err}"
    print("KERNEL_OK")
</pallas_src>

<mosaic_0001>
module attributes {stable_mosaic.version = 11 : i64} {
  func.func @cbam_kernel(%arg0: i32, %arg1: memref<1x32x256xf32, #tpu.memory_space<vmem>>, %arg2: memref<32x2xf32, #tpu.memory_space<vmem>>, %arg3: memref<32x2xf32, #tpu.memory_space<vmem>>, %arg4: memref<98xf32, #tpu.memory_space<smem>>, %arg5: memref<1xf32, #tpu.memory_space<smem>>, %arg6: memref<1x32x256xf32, #tpu.memory_space<vmem>>, %arg7: memref<2x358xf32, #tpu.memory_space<vmem>>) attributes {dimension_semantics = [#tpu.dimension_semantics<parallel>], iteration_bounds = array<i64: 2>, scalar_prefetch = 0 : i64, scratch_operands = 1 : i64, tpu.core_type = #tpu.core_type<tc>, window_params = [{transform_indices = @transform_0, window_bounds = array<i64: 1, 32, 256>}, {pipeline_mode = #tpu.pipeline_mode<synchronous>, transform_indices = @transform_1, window_bounds = array<i64: 32, 2>}, {pipeline_mode = #tpu.pipeline_mode<synchronous>, transform_indices = @transform_2, window_bounds = array<i64: 32, 2>}, {transform_indices = @transform_3, window_bounds = array<i64: 98>}, {transform_indices = @transform_4, window_bounds = array<i64: 1>}, {transform_indices = @transform_5, window_bounds = array<i64: 1, 32, 256>}]} {
    %c0 = arith.constant 0 : index
    %c0_0 = arith.constant 0 : index
    %c0_1 = arith.constant 0 : index
    %0 = vector.load %arg1[%c0, %c0_0, %c0_1] : memref<1x32x256xf32, #tpu.memory_space<vmem>>, vector<1x32x256xf32>
    %1 = vector.shape_cast %0 : vector<1x32x256xf32> to vector<32x256xf32>
    %cst = arith.constant dense<0.000000e+00> : vector<32xf32>
    %2 = vector.multi_reduction <add>, %1, %cst [1] : vector<32x256xf32> to vector<32xf32>
    %3 = vector.shape_cast %2 : vector<32xf32> to vector<32x1xf32>
    %cst_2 = arith.constant 2.560000e+02 : f32
    %4 = vector.broadcast %cst_2 : f32 to vector<32x1xf32>
    %5 = arith.divf %3, %4 : vector<32x1xf32>
    %cst_3 = arith.constant dense<0xFF800000> : vector<32xf32>
    %6 = vector.multi_reduction <maximumf>, %1, %cst_3 [1] : vector<32x256xf32> to vector<32xf32>
    %7 = vector.shape_cast %6 : vector<32xf32> to vector<32x1xf32>
    %c0_4 = arith.constant 0 : index
    %c0_5 = arith.constant 0 : index
    %8 = vector.load %arg2[%c0_4, %c0_5] : memref<32x2xf32, #tpu.memory_space<vmem>>, vector<32x2xf32>
    %c0_6 = arith.constant 0 : index
    %c0_7 = arith.constant 0 : index
    %9 = vector.load %arg3[%c0_6, %c0_7] : memref<32x2xf32, #tpu.memory_space<vmem>>, vector<32x2xf32>
    %10 = vector.broadcast %5 : vector<32x1xf32> to vector<32x2xf32>
    %11 = arith.mulf %8, %10 : vector<32x2xf32>
    %cst_8 = arith.constant dense<0.000000e+00> : vector<2xf32>
    %12 = vector.multi_reduction <add>, %11, %cst_8 [0] : vector<32x2xf32> to vector<2xf32>
    %13 = vector.shape_cast %12 : vector<2xf32> to vector<1x2xf32>
    %cst_9 = arith.constant 0.000000e+00 : f32
    %14 = vector.broadcast %cst_9 : f32 to vector<1x2xf32>
    %15 = arith.maximumf %13, %14 : vector<1x2xf32>
    %16 = vector.broadcast %7 : vector<32x1xf32> to vector<32x2xf32>
    %17 = arith.mulf %8, %16 : vector<32x2xf32>
    %cst_10 = arith.constant dense<0.000000e+00> : vector<2xf32>
    %18 = vector.multi_reduction <add>, %17, %cst_10 [0] : vector<32x2xf32> to vector<2xf32>
    %19 = vector.shape_cast %18 : vector<2xf32> to vector<1x2xf32>
    %cst_11 = arith.constant 0.000000e+00 : f32
    %20 = vector.broadcast %cst_11 : f32 to vector<1x2xf32>
    %21 = arith.maximumf %19, %20 : vector<1x2xf32>
    %22 = arith.addf %15, %21 : vector<1x2xf32>
    %23 = vector.broadcast %22 : vector<1x2xf32> to vector<32x2xf32>
    %24 = arith.mulf %9, %23 : vector<32x2xf32>
    %cst_12 = arith.constant dense<0.000000e+00> : vector<32xf32>
    %25 = vector.multi_reduction <add>, %24, %cst_12 [1] : vector<32x2xf32> to vector<32xf32>
    %26 = vector.shape_cast %25 : vector<32xf32> to vector<32x1xf32>
    %27 = arith.negf %26 : vector<32x1xf32>
    %28 = math.exp %27 : vector<32x1xf32>
    %cst_13 = arith.constant 1.000000e+00 : f32
    %29 = vector.broadcast %cst_13 : f32 to vector<32x1xf32>
    %30 = arith.addf %29, %28 : vector<32x1xf32>
    %31 = arith.divf %29, %30 : vector<32x1xf32>
    %32 = vector.broadcast %31 : vector<32x1xf32> to vector<32x256xf32>
    %33 = arith.mulf %1, %32 : vector<32x256xf32>
    %cst_14 = arith.constant dense<0.000000e+00> : vector<256xf32>
    %34 = vector.multi_reduction <add>, %33, %cst_14 [0] : vector<32x256xf32> to vector<256xf32>
    %35 = vector.shape_cast %34 : vector<256xf32> to vector<1x256xf32>
    %cst_15 = arith.constant 3.200000e+01 : f32
    %36 = vector.broadcast %cst_15 : f32 to vector<1x256xf32>
    %37 = arith.divf %35, %36 : vector<1x256xf32>
    %cst_16 = arith.constant dense<0xFF800000> : vector<256xf32>
    %38 = vector.multi_reduction <maximumf>, %33, %cst_16 [0] : vector<32x256xf32> to vector<256xf32>
    %39 = vector.shape_cast %38 : vector<256xf32> to vector<1x256xf32>
    %cst_17 = arith.constant 0.000000e+00 : f32
    %40 = vector.broadcast %cst_17 : f32 to vector<2x358xf32>
    %c0_18 = arith.constant 0 : index
    %c0_19 = arith.constant 0 : index
    %41 = vector.load %arg7[%c0_18, %c0_19] : memref<2x358xf32, #tpu.memory_space<vmem>>, vector<2x358xf32>
    tpu.vector_store %arg7[%c0_18, %c0_19], %40 {strides = array<i32>} : memref<2x358xf32, #tpu.memory_space<vmem>>, vector<2x358xf32>,
    %c0_20 = arith.constant 0 : index
    %c51 = arith.constant 51 : index
    %42 = vector.load %arg7[%c0_20, %c51] : memref<2x358xf32, #tpu.memory_space<vmem>>, vector<1x256xf32>
    tpu.vector_store %arg7[%c0_20, %c51], %37 {strides = array<i32>} : memref<2x358xf32, #tpu.memory_space<vmem>>, vector<1x256xf32>,
    %c1 = arith.constant 1 : index
    %c51_21 = arith.constant 51 : index
    %43 = vector.load %arg7[%c1, %c51_21] : memref<2x358xf32, #tpu.memory_space<vmem>>, vector<1x256xf32>
    tpu.vector_store %arg7[%c1, %c51_21], %39 {strides = array<i32>} : memref<2x358xf32, #tpu.memory_space<vmem>>, vector<1x256xf32>,
    %44 = tpu.iota {dimensions = array<i32: 1>} : vector<1x256xi32>
    %c15_i32 = arith.constant 15 : i32
    %45 = vector.broadcast %c15_i32 : i32 to vector<1x256xi32>
    %46 = arith.andi %44, %45 : vector<1x256xi32>
    %c-3_i32 = arith.constant -3 : i32
    %47 = vector.broadcast %c-3_i32 : i32 to vector<1x256xi32>
    %48 = arith.addi %46, %47 : vector<1x256xi32>
    %c0_i32 = arith.constant 0 : i32
    %49 = vector.broadcast %c0_i32 : i32 to vector<1x256xi32>
    %50 = arith.cmpi sge, %48, %49 : vector<1x256xi32>
    %c-3_i32_22 = arith.constant -3 : i32
    %51 = vector.broadcast %c-3_i32_22 : i32 to vector<1x256xi32>
    %52 = arith.addi %46, %51 : vector<1x256xi32>
    %c16_i32 = arith.constant 16 : i32
    %53 = vector.broadcast %c16_i32 : i32 to vector<1x256xi32>
    %54 = arith.cmpi slt, %52, %53 : vector<1x256xi32>
    %55 = arith.andi %50, %54 : vector<1x256xi1>
    %c-2_i32 = arith.constant -2 : i32
    %56 = vector.broadcast %c-2_i32 : i32 to vector<1x256xi32>
    %57 = arith.addi %46, %56 : vector<1x256xi32>
    %c0_i32_23 = arith.constant 0 : i32
    %58 = vector.broadcast %c0_i32_23 : i32 to vector<1x256xi32>
    %59 = arith.cmpi sge, %57, %58 : vector<1x256xi32>
    %c-2_i32_24 = arith.constant -2 : i32
    %60 = vector.broadcast %c-2_i32_24 : i32 to vector<1x256xi32>
    %61 = arith.addi %46, %60 : vector<1x256xi32>
    %c16_i32_25 = arith.constant 16 : i32
    %62 = vector.broadcast %c16_i32_25 : i32 to vector<1x256xi32>
    %63 = arith.cmpi slt, %61, %62 : vector<1x256xi32>
    %64 = arith.andi %59, %63 : vector<1x256xi1>
    %c-1_i32 = arith.constant -1 : i32
    %65 = vector.broadcast %c-1_i32 : i32 to vector<1x256xi32>
    %66 = arith.addi %46, %65 : vector<1x256xi32>
    %c0_i32_26 = arith.constant 0 : i32
    %67 = vector.broadcast %c0_i32_26 : i32 to vector<1x256xi32>
    %68 = arith.cmpi sge, %66, %67 : vector<1x256xi32>
    %c-1_i32_27 = arith.constant -1 : i32
    %69 = vector.broadcast %c-1_i32_27 : i32 to vector<1x256xi32>
    %70 = arith.addi %46, %69 : vector<1x256xi32>
    %c16_i32_28 = arith.constant 16 : i32
    %71 = vector.broadcast %c16_i32_28 : i32 to vector<1x256xi32>
    %72 = arith.cmpi slt, %70, %71 : vector<1x256xi32>
    %73 = arith.andi %68, %72 : vector<1x256xi1>
    %c1_i32 = arith.constant 1 : i32
    %74 = vector.broadcast %c1_i32 : i32 to vector<1x256xi32>
    %75 = arith.addi %46, %74 : vector<1x256xi32>
    %c0_i32_29 = arith.constant 0 : i32
    %76 = vector.broadcast %c0_i32_29 : i32 to vector<1x256xi32>
    %77 = arith.cmpi sge, %75, %76 : vector<1x256xi32>
    %c1_i32_30 = arith.constant 1 : i32
    %78 = vector.broadcast %c1_i32_30 : i32 to vector<1x256xi32>
    %79 = arith.addi %46, %78 : vector<1x256xi32>
    %c16_i32_31 = arith.constant 16 : i32
    %80 = vector.broadcast %c16_i32_31 : i32 to vector<1x256xi32>
    %81 = arith.cmpi slt, %79, %80 : vector<1x256xi32>
    %82 = arith.andi %77, %81 : vector<1x256xi1>
    %c2_i32 = arith.constant 2 : i32
    %83 = vector.broadcast %c2_i32 : i32 to vector<1x256xi32>
    %84 = arith.addi %46, %83 : vector<1x256xi32>
    %c0_i32_32 = arith.constant 0 : i32
    %85 = vector.broadcast %c0_i32_32 : i32 to vector<1x256xi32>
    %86 = arith.cmpi sge, %84, %85 : vector<1x256xi32>
    %c2_i32_33 = arith.constant 2 : i32
    %87 = vector.broadcast %c2_i32_33 : i32 to vector<1x256xi32>
    %88 = arith.addi %46, %87 : vector<1x256xi32>
    %c16_i32_34 = arith.constant 16 : i32
    %89 = vector.broadcast %c16_i32_34 : i32 to vector<1x256xi32>
    %90 = arith.cmpi slt, %88, %89 : vector<1x256xi32>
    %91 = arith.andi %86, %90 : vector<1x256xi1>
    %c3_i32 = arith.constant 3 : i32
    %92 = vector.broadcast %c3_i32 : i32 to vector<1x256xi32>
    %93 = arith.addi %46, %92 : vector<1x256xi32>
    %c0_i32_35 = arith.constant 0 : i32
    %94 = vector.broadcast %c0_i32_35 : i32 to vector<1x256xi32>
    %95 = arith.cmpi sge, %93, %94 : vector<1x256xi32>
    %c3_i32_36 = arith.constant 3 : i32
    %96 = vector.broadcast %c3_i32_36 : i32 to vector<1x256xi32>
    %97 = arith.addi %46, %96 : vector<1x256xi32>
    %c16_i32_37 = arith.constant 16 : i32
    %98 = vector.broadcast %c16_i32_37 : i32 to vector<1x256xi32>
    %99 = arith.cmpi slt, %97, %98 : vector<1x256xi32>
    %100 = arith.andi %95, %99 : vector<1x256xi1>
    %c0_38 = arith.constant 0 : index
    %101 = memref.load %arg5[%c0_38] : memref<1xf32, #tpu.memory_space<smem>>
    %102 = vector.broadcast %101 : f32 to vector<1x256xf32>
    %cst_39 = arith.constant 0.000000e+00 : f32
    %103 = vector.broadcast %cst_39 : f32 to vector<1x256xf32>
    %c0_40 = arith.constant 0 : index
    %104 = memref.load %arg4[%c0_40] : memref<98xf32, #tpu.memory_space<smem>>
    %c49 = arith.constant 49 : index
    %105 = memref.load %arg4[%c49] : memref<98xf32, #tpu.memory_space<smem>>
    %c0_41 = arith.constant 0 : index
    %c0_42 = arith.constant 0 : index
    %106 = vector.load %arg7[%c0_41, %c0_42] : memref<2x358xf32, #tpu.memory_space<vmem>>, vector<1x256xf32>
    %107 = vector.broadcast %104 : f32 to vector<1x256xf32>
    %108 = arith.mulf %107, %106 : vector<1x256xf32>
    %109 = arith.addf %103, %108 : vector<1x256xf32>
    %c1_43 = arith.constant 1 : index
    %c0_44 = arith.constant 0 : index
    %110 = vector.load %arg7[%c1_43, %c0_44] : memref<2x358xf32, #tpu.memory_space<vmem>>, vector<1x256xf32>
    %111 = vector.broadcast %105 : f32 to vector<1x256xf32>
    %112 = arith.mulf %111, %110 : vector<1x256xf32>
    %113 = arith.addf %109, %112 : vector<1x256xf32>
    %c7 = arith.constant 7 : index
    %114 = memref.load %arg4[%c7] : memref<98xf32, #tpu.memory_space<smem>>
    %c56 = arith.constant 56 : index
    %115 = memref.load %arg4[%c56] : memref<98xf32, #tpu.memory_space<smem>>
    %c0_45 = arith.constant 0 : index
    %c16 = arith.constant 16 : index
    %116 = vector.load %arg7[%c0_45, %c16] : memref<2x358xf32, #tpu.memory_space<vmem>>, vector<1x256xf32>
    %117 = vector.broadcast %114 : f32 to vector<1x256xf32>
    %118 = arith.mulf %117, %116 : vector<1x256xf32>
    %119 = arith.addf %113, %118 : vector<1x256xf32>
    %c1_46 = arith.constant 1 : index
    %c16_47 = arith.constant 16 : index
    %120 = vector.load %arg7[%c1_46, %c16_47] : memref<2x358xf32, #tpu.memory_space<vmem>>, vector<1x256xf32>
    %121 = vector.broadcast %115 : f32 to vector<1x256xf32>
    %122 = arith.mulf %121, %120 : vector<1x256xf32>
    %123 = arith.addf %119, %122 : vector<1x256xf32>
    %c14 = arith.constant 14 : index
    %124 = memref.load %arg4[%c14] : memref<98xf32, #tpu.memory_space<smem>>
    %c63 = arith.constant 63 : index
    %125 = memref.load %arg4[%c63] : memref<98xf32, #tpu.memory_space<smem>>
    %c0_48 = arith.constant 0 : index
    %c32 = arith.constant 32 : index
    %126 = vector.load %arg7[%c0_48, %c32] : memref<2x358xf32, #tpu.memory_space<vmem>>, vector<1x256xf32>
    %127 = vector.broadcast %124 : f32 to vector<1x256xf32>
    %128 = arith.mulf %127, %126 : vector<1x256xf32>
    %129 = arith.addf %123, %128 : vector<1x256xf32>
    %c1_49 = arith.constant 1 : index
    %c32_50 = arith.constant 32 : index
    %130 = vector.load %arg7[%c1_49, %c32_50] : memref<2x358xf32, #tpu.memory_space<vmem>>, vector<1x256xf32>
    %131 = vector.broadcast %125 : f32 to vector<1x256xf32>
    %132 = arith.mulf %131, %130 : vector<1x256xf32>
    %133 = arith.addf %129, %132 : vector<1x256xf32>
    %c21 = arith.constant 21 : index
    %134 = memref.load %arg4[%c21] : memref<98xf32, #tpu.memory_space<smem>>
    %c70 = arith.constant 70 : index
    %135 = memref.load %arg4[%c70] : memref<98xf32, #tpu.memory_space<smem>>
    %c0_51 = arith.constant 0 : index
    %c48 = arith.constant 48 : index
    %136 = vector.load %arg7[%c0_51, %c48] : memref<2x358xf32, #tpu.memory_space<vmem>>, vector<1x256xf32>
    %137 = vector.broadcast %134 : f32 to vector<1x256xf32>
    %138 = arith.mulf %137, %136 : vector<1x256xf32>
    %139 = arith.addf %133, %138 : vector<1x256xf32>
    %c1_52 = arith.constant 1 : index
    %c48_53 = arith.constant 48 : index
    %140 = vector.load %arg7[%c1_52, %c48_53] : memref<2x358xf32, #tpu.memory_space<vmem>>, vector<1x256xf32>
    %141 = vector.broadcast %135 : f32 to vector<1x256xf32>
    %142 = arith.mulf %141, %140 : vector<1x256xf32>
    %143 = arith.addf %139, %142 : vector<1x256xf32>
    %c28 = arith.constant 28 : index
    %144 = memref.load %arg4[%c28] : memref<98xf32, #tpu.memory_space<smem>>
    %c77 = arith.constant 77 : index
    %145 = memref.load %arg4[%c77] : memref<98xf32, #tpu.memory_space<smem>>
    %c0_54 = arith.constant 0 : index
    %c64 = arith.constant 64 : index
    %146 = vector.load %arg7[%c0_54, %c64] : memref<2x358xf32, #tpu.memory_space<vmem>>, vector<1x256xf32>
    %147 = vector.broadcast %144 : f32 to vector<1x256xf32>
    %148 = arith.mulf %147, %146 : vector<1x256xf32>
    %149 = arith.addf %143, %148 : vector<1x256xf32>
    %c1_55 = arith.constant 1 : index
    %c64_56 = arith.constant 64 : index
    %150 = vector.load %arg7[%c1_55, %c64_56] : memref<2x358xf32, #tpu.memory_space<vmem>>, vector<1x256xf32>
    %151 = vector.broadcast %145 : f32 to vector<1x256xf32>
    %152 = arith.mulf %151, %150 : vector<1x256xf32>
    %153 = arith.addf %149, %152 : vector<1x256xf32>
    %c35 = arith.constant 35 : index
    %154 = memref.load %arg4[%c35] : memref<98xf32, #tpu.memory_space<smem>>
    %c84 = arith.constant 84 : index
    %155 = memref.load %arg4[%c84] : memref<98xf32, #tpu.memory_space<smem>>
    %c0_57 = arith.constant 0 : index
    %c80 = arith.constant 80 : index
    %156 = vector.load %arg7[%c0_57, %c80] : memref<2x358xf32, #tpu.memory_space<vmem>>, vector<1x256xf32>
    %157 = vector.broadcast %154 : f32 to vector<1x256xf32>
    %158 = arith.mulf %157, %156 : vector<1x256xf32>
    %159 = arith.addf %153, %158 : vector<1x256xf32>
    %c1_58 = arith.constant 1 : index
    %c80_59 = arith.constant 80 : index
    %160 = vector.load %arg7[%c1_58, %c80_59] : memref<2x358xf32, #tpu.memory_space<vmem>>, vector<1x256xf32>
    %161 = vector.broadcast %155 : f32 to vector<1x256xf32>
    %162 = arith.mulf %161, %160 : vector<1x256xf32>
    %163 = arith.addf %159, %162 : vector<1x256xf32>
    %c42 = arith.constant 42 : index
    %164 = memref.load %arg4[%c42] : memref<98xf32, #tpu.memory_space<smem>>
    %c91 = arith.constant 91 : index
    %165 = memref.load %arg4[%c91] : memref<98xf32, #tpu.memory_space<smem>>
    %c0_60 = arith.constant 0 : index
    %c96 = arith.constant 96 : index
    %166 = vector.load %arg7[%c0_60, %c96] : memref<2x358xf32, #tpu.memory_space<vmem>>, vector<1x256xf32>
    %167 = vector.broadcast %164 : f32 to vector<1x256xf32>
    %168 = arith.mulf %167, %166 : vector<1x256xf32>
    %169 = arith.addf %163, %168 : vector<1x256xf32>
    %c1_61 = arith.constant 1 : index
    %c96_62 = arith.constant 96 : index
    %170 = vector.load %arg7[%c1_61, %c96_62] : memref<2x358xf32, #tpu.memory_space<vmem>>, vector<1x256xf32>
    %171 = vector.broadcast %165 : f32 to vector<1x256xf32>
    %172 = arith.mulf %171, %170 : vector<1x256xf32>
    %173 = arith.addf %169, %172 : vector<1x256xf32>
    %cst_63 = arith.constant 0.000000e+00 : f32
    %174 = vector.broadcast %cst_63 : f32 to vector<1x256xf32>
    %175 = arith.select %55, %173, %174 : vector<1x256xi1>, vector<1x256xf32>
    %176 = arith.addf %102, %175 : vector<1x256xf32>
    %cst_64 = arith.constant 0.000000e+00 : f32
    %177 = vector.broadcast %cst_64 : f32 to vector<1x256xf32>
    %c1_65 = arith.constant 1 : index
    %178 = memref.load %arg4[%c1_65] : memref<98xf32, #tpu.memory_space<smem>>
    %c50 = arith.constant 50 : index
    %179 = memref.load %arg4[%c50] : memref<98xf32, #tpu.memory_space<smem>>
    %c0_66 = arith.constant 0 : index
    %c1_67 = arith.constant 1 : index
    %180 = vector.load %arg7[%c0_66, %c1_67] : memref<2x358xf32, #tpu.memory_space<vmem>>, vector<1x256xf32>
    %181 = vector.broadcast %178 : f32 to vector<1x256xf32>
    %182 = arith.mulf %181, %180 : vector<1x256xf32>
    %183 = arith.addf %177, %182 : vector<1x256xf32>
    %c1_68 = arith.constant 1 : index
    %c1_69 = arith.constant 1 : index
    %184 = vector.load %arg7[%c1_68, %c1_69] : memref<2x358xf32, #tpu.memory_space<vmem>>, vector<1x256xf32>
    %185 = vector.broadcast %179 : f32 to vector<1x256xf32>
    %186 = arith.mulf %185, %184 : vector<1x256xf32>
    %187 = arith.addf %183, %186 : vector<1x256xf32>
    %c8 = arith.constant 8 : index
    %188 = memref.load %arg4[%c8] : memref<98xf32, #tpu.memory_space<smem>>
    %c57 = arith.constant 57 : index
    %189 = memref.load %arg4[%c57] : memref<98xf32, #tpu.memory_space<smem>>
    %c0_70 = arith.constant 0 : index
    %c17 = arith.constant 17 : index
    %190 = vector.load %arg7[%c0_70, %c17] : memref<2x358xf32, #tpu.memory_space<vmem>>, vector<1x256xf32>
    %191 = vector.broadcast %188 : f32 to vector<1x256xf32>
    %192 = arith.mulf %191, %190 : vector<1x256xf32>
    %193 = arith.addf %187, %192 : vector<1x256xf32>
    %c1_71 = arith.constant 1 : index
    %c17_72 = arith.constant 17 : index
    %194 = vector.load %arg7[%c1_71, %c17_72] : memref<2x358xf32, #tpu.memory_space<vmem>>, vector<1x256xf32>
    %195 = vector.broadcast %189 : f32 to vector<1x256xf32>
    %196 = arith.mulf %195, %194 : vector<1x256xf32>
    %197 = arith.addf %193, %196 : vector<1x256xf32>
    %c15 = arith.constant 15 : index
    %198 = memref.load %arg4[%c15] : memref<98xf32, #tpu.memory_space<smem>>
    %c64_73 = arith.constant 64 : index
    %199 = memref.load %arg4[%c64_73] : memref<98xf32, #tpu.memory_space<smem>>
    %c0_74 = arith.constant 0 : index
    %c33 = arith.constant 33 : index
    %200 = vector.load %arg7[%c0_74, %c33] : memref<2x358xf32, #tpu.memory_space<vmem>>, vector<1x256xf32>
    %201 = vector.broadcast %198 : f32 to vector<1x256xf32>
    %202 = arith.mulf %201, %200 : vector<1x256xf32>
    %203 = arith.addf %197, %202 : vector<1x256xf32>
    %c1_75 = arith.constant 1 : index
    %c33_76 = arith.constant 33 : index
    %204 = vector.load %arg7[%c1_75, %c33_76] : memref<2x358xf32, #tpu.memory_space<vmem>>, vector<1x256xf32>
    %205 = vector.broadcast %199 : f32 to vector<1x256xf32>
    %206 = arith.mulf %205, %204 : vector<1x256xf32>
    %207 = arith.addf %203, %206 : vector<1x256xf32>
    %c22 = arith.constant 22 : index
    %208 = memref.load %arg4[%c22] : memref<98xf32, #tpu.memory_space<smem>>
    %c71 = arith.constant 71 : index
    %209 = memref.load %arg4[%c71] : memref<98xf32, #tpu.memory_space<smem>>
    %c0_77 = arith.constant 0 : index
    %c49_78 = arith.constant 49 : index
    %210 = vector.load %arg7[%c0_77, %c49_78] : memref<2x358xf32, #tpu.memory_space<vmem>>, vector<1x256xf32>
    %211 = vector.broadcast %208 : f32 to vector<1x256xf32>
    %212 = arith.mulf %211, %210 : vector<1x256xf32>
    %213 = arith.addf %207, %212 : vector<1x256xf32>
    %c1_79 = arith.constant 1 : index
    %c49_80 = arith.constant 49 : index
    %214 = vector.load %arg7[%c1_79, %c49_80] : memref<2x358xf32, #tpu.memory_space<vmem>>, vector<1x256xf32>
    %215 = vector.broadcast %209 : f32 to vector<1x256xf32>
    %216 = arith.mulf %215, %214 : vector<1x256xf32>
    %217 = arith.addf %213, %216 : vector<1x256xf32>
    %c29 = arith.constant 29 : index
    %218 = memref.load %arg4[%c29] : memref<98xf32, #tpu.memory_space<smem>>
    %c78 = arith.constant 78 : index
    %219 = memref.load %arg4[%c78] : memref<98xf32, #tpu.memory_space<smem>>
    %c0_81 = arith.constant 0 : index
    %c65 = arith.constant 65 : index
    %220 = vector.load %arg7[%c0_81, %c65] : memref<2x358xf32, #tpu.memory_space<vmem>>, vector<1x256xf32>
    %221 = vector.broadcast %218 : f32 to vector<1x256xf32>
    %222 = arith.mulf %221, %220 : vector<1x256xf32>
    %223 = arith.addf %217, %222 : vector<1x256xf32>
    %c1_82 = arith.constant 1 : index
    %c65_83 = arith.constant 65 : index
    %224 = vector.load %arg7[%c1_82, %c65_83] : memref<2x358xf32, #tpu.memory_space<vmem>>, vector<1x256xf32>
    %225 = vector.broadcast %219 : f32 to vector<1x256xf32>
    %226 = arith.mulf %225, %224 : vector<1x256xf32>
    %227 = arith.addf %223, %226 : vector<1x256xf32>
    %c36 = arith.constant 36 : index
    %228 = memref.load %arg4[%c36] : memref<98xf32, #tpu.memory_space<smem>>
    %c85 = arith.constant 85 : index
    %229 = memref.load %arg4[%c85] : memref<98xf32, #tpu.memory_space<smem>>
    %c0_84 = arith.constant 0 : index
    %c81 = arith.constant 81 : index
    %230 = vector.load %arg7[%c0_84, %c81] : memref<2x358xf32, #tpu.memory_space<vmem>>, vector<1x256xf32>
    %231 = vector.broadcast %228 : f32 to vector<1x256xf32>
    %232 = arith.mulf %231, %230 : vector<1x256xf32>
    %233 = arith.addf %227, %232 : vector<1x256xf32>
    %c1_85 = arith.constant 1 : index
    %c81_86 = arith.constant 81 : index
    %234 = vector.load %arg7[%c1_85, %c81_86] : memref<2x358xf32, #tpu.memory_space<vmem>>, vector<1x256xf32>
    %235 = vector.broadcast %229 : f32 to vector<1x256xf32>
    %236 = arith.mulf %235, %234 : vector<1x256xf32>
    %237 = arith.addf %233, %236 : vector<1x256xf32>
    %c43 = arith.constant 43 : index
    %238 = memref.load %arg4[%c43] : memref<98xf32, #tpu.memory_space<smem>>
    %c92 = arith.constant 92 : index
    %239 = memref.load %arg4[%c92] : memref<98xf32, #tpu.memory_space<smem>>
    %c0_87 = arith.constant 0 : index
    %c97 = arith.constant 97 : index
    %240 = vector.load %arg7[%c0_87, %c97] : memref<2x358xf32, #tpu.memory_space<vmem>>, vector<1x256xf32>
    %241 = vector.broadcast %238 : f32 to vector<1x256xf32>
    %242 = arith.mulf %241, %240 : vector<1x256xf32>
    %243 = arith.addf %237, %242 : vector<1x256xf32>
    %c1_88 = arith.constant 1 : index
    %c97_89 = arith.constant 97 : index
    %244 = vector.load %arg7[%c1_88, %c97_89] : memref<2x358xf32, #tpu.memory_space<vmem>>, vector<1x256xf32>
    %245 = vector.broadcast %239 : f32 to vector<1x256xf32>
    %246 = arith.mulf %245, %244 : vector<1x256xf32>
    %247 = arith.addf %243, %246 : vector<1x256xf32>
    %cst_90 = arith.constant 0.000000e+00 : f32
    %248 = vector.broadcast %cst_90 : f32 to vector<1x256xf32>
    %249 = arith.select %64, %247, %248 : vector<1x256xi1>, vector<1x256xf32>
    %250 = arith.addf %176, %249 : vector<1x256xf32>
    %cst_91 = arith.constant 0.000000e+00 : f32
    %251 = vector.broadcast %cst_91 : f32 to vector<1x256xf32>
    %c2 = arith.constant 2 : index
    %252 = memref.load %arg4[%c2] : memref<98xf32, #tpu.memory_space<smem>>
    %c51_92 = arith.constant 51 : index
    %253 = memref.load %arg4[%c51_92] : memref<98xf32, #tpu.memory_space<smem>>
    %c0_93 = arith.constant 0 : index
    %c2_94 = arith.constant 2 : index
    %254 = vector.load %arg7[%c0_93, %c2_94] : memref<2x358xf32, #tpu.memory_space<vmem>>, vector<1x256xf32>
    %255 = vector.broadcast %252 : f32 to vector<1x256xf32>
    %256 = arith.mulf %255, %254 : vector<1x256xf32>
    %257 = arith.addf %251, %256 : vector<1x256xf32>
    %c1_95 = arith.constant 1 : index
    %c2_96 = arith.constant 2 : index
    %258 = vector.load %arg7[%c1_95, %c2_96] : memref<2x358xf32, #tpu.memory_space<vmem>>, vector<1x256xf32>
    %259 = vector.broadcast %253 : f32 to vector<1x256xf32>
    %260 = arith.mulf %259, %258 : vector<1x256xf32>
    %261 = arith.addf %257, %260 : vector<1x256xf32>
    %c9 = arith.constant 9 : index
    %262 = memref.load %arg4[%c9] : memref<98xf32, #tpu.memory_space<smem>>
    %c58 = arith.constant 58 : index
    %263 = memref.load %arg4[%c58] : memref<98xf32, #tpu.memory_space<smem>>
    %c0_97 = arith.constant 0 : index
    %c18 = arith.constant 18 : index
    %264 = vector.load %arg7[%c0_97, %c18] : memref<2x358xf32, #tpu.memory_space<vmem>>, vector<1x256xf32>
    %265 = vector.broadcast %262 : f32 to vector<1x256xf32>
    %266 = arith.mulf %265, %264 : vector<1x256xf32>
    %267 = arith.addf %261, %266 : vector<1x256xf32>
    %c1_98 = arith.constant 1 : index
    %c18_99 = arith.constant 18 : index
    %268 = vector.load %arg7[%c1_98, %c18_99] : memref<2x358xf32, #tpu.memory_space<vmem>>, vector<1x256xf32>
    %269 = vector.broadcast %263 : f32 to vector<1x256xf32>
    %270 = arith.mulf %269, %268 : vector<1x256xf32>
    %271 = arith.addf %267, %270 : vector<1x256xf32>
    %c16_100 = arith.constant 16 : index
    %272 = memref.load %arg4[%c16_100] : memref<98xf32, #tpu.memory_space<smem>>
    %c65_101 = arith.constant 65 : index
    %273 = memref.load %arg4[%c65_101] : memref<98xf32, #tpu.memory_space<smem>>
    %c0_102 = arith.constant 0 : index
    %c34 = arith.constant 34 : index
    %274 = vector.load %arg7[%c0_102, %c34] : memref<2x358xf32, #tpu.memory_space<vmem>>, vector<1x256xf32>
    %275 = vector.broadcast %272 : f32 to vector<1x256xf32>
    %276 = arith.mulf %275, %274 : vector<1x256xf32>
    %277 = arith.addf %271, %276 : vector<1x256xf32>
    %c1_103 = arith.constant 1 : index
    %c34_104 = arith.constant 34 : index
    %278 = vector.load %arg7[%c1_103, %c34_104] : memref<2x358xf32, #tpu.memory_space<vmem>>, vector<1x256xf32>
    %279 = vector.broadcast %273 : f32 to vector<1x256xf32>
    %280 = arith.mulf %279, %278 : vector<1x256xf32>
    %281 = arith.addf %277, %280 : vector<1x256xf32>
    %c23 = arith.constant 23 : index
    %282 = memref.load %arg4[%c23] : memref<98xf32, #tpu.memory_space<smem>>
    %c72 = arith.constant 72 : index
    %283 = memref.load %arg4[%c72] : memref<98xf32, #tpu.memory_space<smem>>
    %c0_105 = arith.constant 0 : index
    %c50_106 = arith.constant 50 : index
    %284 = vector.load %arg7[%c0_105, %c50_106] : memref<2x358xf32, #tpu.memory_space<vmem>>, vector<1x256xf32>
    %285 = vector.broadcast %282 : f32 to vector<1x256xf32>
    %286 = arith.mulf %285, %284 : vector<1x256xf32>
    %287 = arith.addf %281, %286 : vector<1x256xf32>
    %c1_107 = arith.constant 1 : index
    %c50_108 = arith.constant 50 : index
    %288 = vector.load %arg7[%c1_107, %c50_108] : memref<2x358xf32, #tpu.memory_space<vmem>>, vector<1x256xf32>
    %289 = vector.broadcast %283 : f32 to vector<1x256xf32>
    %290 = arith.mulf %289, %288 : vector<1x256xf32>
    %291 = arith.addf %287, %290 : vector<1x256xf32>
    %c30 = arith.constant 30 : index
    %292 = memref.load %arg4[%c30] : memref<98xf32, #tpu.memory_space<smem>>
    %c79 = arith.constant 79 : index
    %293 = memref.load %arg4[%c79] : memref<98xf32, #tpu.memory_space<smem>>
    %c0_109 = arith.constant 0 : index
    %c66 = arith.constant 66 : index
    %294 = vector.load %arg7[%c0_109, %c66] : memref<2x358xf32, #tpu.memory_space<vmem>>, vector<1x256xf32>
    %295 = vector.broadcast %292 : f32 to vector<1x256xf32>
    %296 = arith.mulf %295, %294 : vector<1x256xf32>
    %297 = arith.addf %291, %296 : vector<1x256xf32>
    %c1_110 = arith.constant 1 : index
    %c66_111 = arith.constant 66 : index
    %298 = vector.load %arg7[%c1_110, %c66_111] : memref<2x358xf32, #tpu.memory_space<vmem>>, vector<1x256xf32>
    %299 = vector.broadcast %293 : f32 to vector<1x256xf32>
    %300 = arith.mulf %299, %298 : vector<1x256xf32>
    %301 = arith.addf %297, %300 : vector<1x256xf32>
    %c37 = arith.constant 37 : index
    %302 = memref.load %arg4[%c37] : memref<98xf32, #tpu.memory_space<smem>>
    %c86 = arith.constant 86 : index
    %303 = memref.load %arg4[%c86] : memref<98xf32, #tpu.memory_space<smem>>
    %c0_112 = arith.constant 0 : index
    %c82 = arith.constant 82 : index
    %304 = vector.load %arg7[%c0_112, %c82] : memref<2x358xf32, #tpu.memory_space<vmem>>, vector<1x256xf32>
    %305 = vector.broadcast %302 : f32 to vector<1x256xf32>
    %306 = arith.mulf %305, %304 : vector<1x256xf32>
    %307 = arith.addf %301, %306 : vector<1x256xf32>
    %c1_113 = arith.constant 1 : index
    %c82_114 = arith.constant 82 : index
    %308 = vector.load %arg7[%c1_113, %c82_114] : memref<2x358xf32, #tpu.memory_space<vmem>>, vector<1x256xf32>
    %309 = vector.broadcast %303 : f32 to vector<1x256xf32>
    %310 = arith.mulf %309, %308 : vector<1x256xf32>
    %311 = arith.addf %307, %310 : vector<1x256xf32>
    %c44 = arith.constant 44 : index
    %312 = memref.load %arg4[%c44] : memref<98xf32, #tpu.memory_space<smem>>
    %c93 = arith.constant 93 : index
    %313 = memref.load %arg4[%c93] : memref<98xf32, #tpu.memory_space<smem>>
    %c0_115 = arith.constant 0 : index
    %c98 = arith.constant 98 : index
    %314 = vector.load %arg7[%c0_115, %c98] : memref<2x358xf32, #tpu.memory_space<vmem>>, vector<1x256xf32>
    %315 = vector.broadcast %312 : f32 to vector<1x256xf32>
    %316 = arith.mulf %315, %314 : vector<1x256xf32>
    %317 = arith.addf %311, %316 : vector<1x256xf32>
    %c1_116 = arith.constant 1 : index
    %c98_117 = arith.constant 98 : index
    %318 = vector.load %arg7[%c1_116, %c98_117] : memref<2x358xf32, #tpu.memory_space<vmem>>, vector<1x256xf32>
    %319 = vector.broadcast %313 : f32 to vector<1x256xf32>
    %320 = arith.mulf %319, %318 : vector<1x256xf32>
    %321 = arith.addf %317, %320 : vector<1x256xf32>
    %cst_118 = arith.constant 0.000000e+00 : f32
    %322 = vector.broadcast %cst_118 : f32 to vector<1x256xf32>
    %323 = arith.select %73, %321, %322 : vector<1x256xi1>, vector<1x256xf32>
    %324 = arith.addf %250, %323 : vector<1x256xf32>
    %cst_119 = arith.constant 0.000000e+00 : f32
    %325 = vector.broadcast %cst_119 : f32 to vector<1x256xf32>
    %c3 = arith.constant 3 : index
    %326 = memref.load %arg4[%c3] : memref<98xf32, #tpu.memory_space<smem>>
    %c52 = arith.constant 52 : index
    %327 = memref.load %arg4[%c52] : memref<98xf32, #tpu.memory_space<smem>>
    %c0_120 = arith.constant 0 : index
    %c3_121 = arith.constant 3 : index
    %328 = vector.load %arg7[%c0_120, %c3_121] : memref<2x358xf32, #tpu.memory_space<vmem>>, vector<1x256xf32>
    %329 = vector.broadcast %326 : f32 to vector<1x256xf32>
    %330 = arith.mulf %329, %328 : vector<1x256xf32>
    %331 = arith.addf %325, %330 : vector<1x256xf32>
    %c1_122 = arith.constant 1 : index
    %c3_123 = arith.constant 3 : index
    %332 = vector.load %arg7[%c1_122, %c3_123] : memref<2x358xf32, #tpu.memory_space<vmem>>, vector<1x256xf32>
    %333 = vector.broadcast %327 : f32 to vector<1x256xf32>
    %334 = arith.mulf %333, %332 : vector<1x256xf32>
    %335 = arith.addf %331, %334 : vector<1x256xf32>
    %c10 = arith.constant 10 : index
    %336 = memref.load %arg4[%c10] : memref<98xf32, #tpu.memory_space<smem>>
    %c59 = arith.constant 59 : index
    %337 = memref.load %arg4[%c59] : memref<98xf32, #tpu.memory_space<smem>>
    %c0_124 = arith.constant 0 : index
    %c19 = arith.constant 19 : index
    %338 = vector.load %arg7[%c0_124, %c19] : memref<2x358xf32, #tpu.memory_space<vmem>>, vector<1x256xf32>
    %339 = vector.broadcast %336 : f32 to vector<1x256xf32>
    %340 = arith.mulf %339, %338 : vector<1x256xf32>
    %341 = arith.addf %335, %340 : vector<1x256xf32>
    %c1_125 = arith.constant 1 : index
    %c19_126 = arith.constant 19 : index
    %342 = vector.load %arg7[%c1_125, %c19_126] : memref<2x358xf32, #tpu.memory_space<vmem>>, vector<1x256xf32>
    %343 = vector.broadcast %337 : f32 to vector<1x256xf32>
    %344 = arith.mulf %343, %342 : vector<1x256xf32>
    %345 = arith.addf %341, %344 : vector<1x256xf32>
    %c17_127 = arith.constant 17 : index
    %346 = memref.load %arg4[%c17_127] : memref<98xf32, #tpu.memory_space<smem>>
    %c66_128 = arith.constant 66 : index
    %347 = memref.load %arg4[%c66_128] : memref<98xf32, #tpu.memory_space<smem>>
    %c0_129 = arith.constant 0 : index
    %c35_130 = arith.constant 35 : index
    %348 = vector.load %arg7[%c0_129, %c35_130] : memref<2x358xf32, #tpu.memory_space<vmem>>, vector<1x256xf32>
    %349 = vector.broadcast %346 : f32 to vector<1x256xf32>
    %350 = arith.mulf %349, %348 : vector<1x256xf32>
    %351 = arith.addf %345, %350 : vector<1x256xf32>
    %c1_131 = arith.constant 1 : index
    %c35_132 = arith.constant 35 : index
    %352 = vector.load %arg7[%c1_131, %c35_132] : memref<2x358xf32, #tpu.memory_space<vmem>>, vector<1x256xf32>
    %353 = vector.broadcast %347 : f32 to vector<1x256xf32>
    %354 = arith.mulf %353, %352 : vector<1x256xf32>
    %355 = arith.addf %351, %354 : vector<1x256xf32>
    %c24 = arith.constant 24 : index
    %356 = memref.load %arg4[%c24] : memref<98xf32, #tpu.memory_space<smem>>
    %c73 = arith.constant 73 : index
    %357 = memref.load %arg4[%c73] : memref<98xf32, #tpu.memory_space<smem>>
    %c0_133 = arith.constant 0 : index
    %c51_134 = arith.constant 51 : index
    %358 = vector.load %arg7[%c0_133, %c51_134] : memref<2x358xf32, #tpu.memory_space<vmem>>, vector<1x256xf32>
    %359 = vector.broadcast %356 : f32 to vector<1x256xf32>
    %360 = arith.mulf %359, %358 : vector<1x256xf32>
    %361 = arith.addf %355, %360 : vector<1x256xf32>
    %c1_135 = arith.constant 1 : index
    %c51_136 = arith.constant 51 : index
    %362 = vector.load %arg7[%c1_135, %c51_136] : memref<2x358xf32, #tpu.memory_space<vmem>>, vector<1x256xf32>
    %363 = vector.broadcast %357 : f32 to vector<1x256xf32>
    %364 = arith.mulf %363, %362 : vector<1x256xf32>
    %365 = arith.addf %361, %364 : vector<1x256xf32>
    %c31 = arith.constant 31 : index
    %366 = memref.load %arg4[%c31] : memref<98xf32, #tpu.memory_space<smem>>
    %c80_137 = arith.constant 80 : index
    %367 = memref.load %arg4[%c80_137] : memref<98xf32, #tpu.memory_space<smem>>
    %c0_138 = arith.constant 0 : index
    %c67 = arith.constant 67 : index
    %368 = vector.load %arg7[%c0_138, %c67] : memref<2x358xf32, #tpu.memory_space<vmem>>, vector<1x256xf32>
    %369 = vector.broadcast %366 : f32 to vector<1x256xf32>
    %370 = arith.mulf %369, %368 : vector<1x256xf32>
    %371 = arith.addf %365, %370 : vector<1x256xf32>
    %c1_139 = arith.constant 1 : index
    %c67_140 = arith.constant 67 : index
    %372 = vector.load %arg7[%c1_139, %c67_140] : memref<2x358xf32, #tpu.memory_space<vmem>>, vector<1x256xf32>
    %373 = vector.broadcast %367 : f32 to vector<1x256xf32>
    %374 = arith.mulf %373, %372 : vector<1x256xf32>
    %375 = arith.addf %371, %374 : vector<1x256xf32>
    %c38 = arith.constant 38 : index
    %376 = memref.load %arg4[%c38] : memref<98xf32, #tpu.memory_space<smem>>
    %c87 = arith.constant 87 : index
    %377 = memref.load %arg4[%c87] : memref<98xf32, #tpu.memory_space<smem>>
    %c0_141 = arith.constant 0 : index
    %c83 = arith.constant 83 : index
    %378 = vector.load %arg7[%c0_141, %c83] : memref<2x358xf32, #tpu.memory_space<vmem>>, vector<1x256xf32>
    %379 = vector.broadcast %376 : f32 to vector<1x256xf32>
    %380 = arith.mulf %379, %378 : vector<1x256xf32>
    %381 = arith.addf %375, %380 : vector<1x256xf32>
    %c1_142 = arith.constant 1 : index
    %c83_143 = arith.constant 83 : index
    %382 = vector.load %arg7[%c1_142, %c83_143] : memref<2x358xf32, #tpu.memory_space<vmem>>, vector<1x256xf32>
    %383 = vector.broadcast %377 : f32 to vector<1x256xf32>
    %384 = arith.mulf %383, %382 : vector<1x256xf32>
    %385 = arith.addf %381, %384 : vector<1x256xf32>
    %c45 = arith.constant 45 : index
    %386 = memref.load %arg4[%c45] : memref<98xf32, #tpu.memory_space<smem>>
    %c94 = arith.constant 94 : index
    %387 = memref.load %arg4[%c94] : memref<98xf32, #tpu.memory_space<smem>>
    %c0_144 = arith.constant 0 : index
    %c99 = arith.constant 99 : index
    %388 = vector.load %arg7[%c0_144, %c99] : memref<2x358xf32, #tpu.memory_space<vmem>>, vector<1x256xf32>
    %389 = vector.broadcast %386 : f32 to vector<1x256xf32>
    %390 = arith.mulf %389, %388 : vector<1x256xf32>
    %391 = arith.addf %385, %390 : vector<1x256xf32>
    %c1_145 = arith.constant 1 : index
    %c99_146 = arith.constant 99 : index
    %392 = vector.load %arg7[%c1_145, %c99_146] : memref<2x358xf32, #tpu.memory_space<vmem>>, vector<1x256xf32>
    %393 = vector.broadcast %387 : f32 to vector<1x256xf32>
    %394 = arith.mulf %393, %392 : vector<1x256xf32>
    %395 = arith.addf %391, %394 : vector<1x256xf32>
    %396 = arith.addf %324, %395 : vector<1x256xf32>
    %cst_147 = arith.constant 0.000000e+00 : f32
    %397 = vector.broadcast %cst_147 : f32 to vector<1x256xf32>
    %c4 = arith.constant 4 : index
    %398 = memref.load %arg4[%c4] : memref<98xf32, #tpu.memory_space<smem>>
    %c53 = arith.constant 53 : index
    %399 = memref.load %arg4[%c53] : memref<98xf32, #tpu.memory_space<smem>>
    %c0_148 = arith.constant 0 : index
    %c4_149 = arith.constant 4 : index
    %400 = vector.load %arg7[%c0_148, %c4_149] : memref<2x358xf32, #tpu.memory_space<vmem>>, vector<1x256xf32>
    %401 = vector.broadcast %398 : f32 to vector<1x256xf32>
    %402 = arith.mulf %401, %400 : vector<1x256xf32>
    %403 = arith.addf %397, %402 : vector<1x256xf32>
    %c1_150 = arith.constant 1 : index
    %c4_151 = arith.constant 4 : index
    %404 = vector.load %arg7[%c1_150, %c4_151] : memref<2x358xf32, #tpu.memory_space<vmem>>, vector<1x256xf32>
    %405 = vector.broadcast %399 : f32 to vector<1x256xf32>
    %406 = arith.mulf %405, %404 : vector<1x256xf32>
    %407 = arith.addf %403, %406 : vector<1x256xf32>
    %c11 = arith.constant 11 : index
    %408 = memref.load %arg4[%c11] : memref<98xf32, #tpu.memory_space<smem>>
    %c60 = arith.constant 60 : index
    %409 = memref.load %arg4[%c60] : memref<98xf32, #tpu.memory_space<smem>>
    %c0_152 = arith.constant 0 : index
    %c20 = arith.constant 20 : index
    %410 = vector.load %arg7[%c0_152, %c20] : memref<2x358xf32, #tpu.memory_space<vmem>>, vector<1x256xf32>
    %411 = vector.broadcast %408 : f32 to vector<1x256xf32>
    %412 = arith.mulf %411, %410 : vector<1x256xf32>
    %413 = arith.addf %407, %412 : vector<1x256xf32>
    %c1_153 = arith.constant 1 : index
    %c20_154 = arith.constant 20 : index
    %414 = vector.load %arg7[%c1_153, %c20_154] : memref<2x358xf32, #tpu.memory_space<vmem>>, vector<1x256xf32>
    %415 = vector.broadcast %409 : f32 to vector<1x256xf32>
    %416 = arith.mulf %415, %414 : vector<1x256xf32>
    %417 = arith.addf %413, %416 : vector<1x256xf32>
    %c18_155 = arith.constant 18 : index
    %418 = memref.load %arg4[%c18_155] : memref<98xf32, #tpu.memory_space<smem>>
    %c67_156 = arith.constant 67 : index
    %419 = memref.load %arg4[%c67_156] : memref<98xf32, #tpu.memory_space<smem>>
    %c0_157 = arith.constant 0 : index
    %c36_158 = arith.constant 36 : index
    %420 = vector.load %arg7[%c0_157, %c36_158] : memref<2x358xf32, #tpu.memory_space<vmem>>, vector<1x256xf32>
    %421 = vector.broadcast %418 : f32 to vector<1x256xf32>
    %422 = arith.mulf %421, %420 : vector<1x256xf32>
    %423 = arith.addf %417, %422 : vector<1x256xf32>
    %c1_159 = arith.constant 1 : index
    %c36_160 = arith.constant 36 : index
    %424 = vector.load %arg7[%c1_159, %c36_160] : memref<2x358xf32, #tpu.memory_space<vmem>>, vector<1x256xf32>
    %425 = vector.broadcast %419 : f32 to vector<1x256xf32>
    %426 = arith.mulf %425, %424 : vector<1x256xf32>
    %427 = arith.addf %423, %426 : vector<1x256xf32>
    %c25 = arith.constant 25 : index
    %428 = memref.load %arg4[%c25] : memref<98xf32, #tpu.memory_space<smem>>
    %c74 = arith.constant 74 : index
    %429 = memref.load %arg4[%c74] : memref<98xf32, #tpu.memory_space<smem>>
    %c0_161 = arith.constant 0 : index
    %c52_162 = arith.constant 52 : index
    %430 = vector.load %arg7[%c0_161, %c52_162] : memref<2x358xf32, #tpu.memory_space<vmem>>, vector<1x256xf32>
    %431 = vector.broadcast %428 : f32 to vector<1x256xf32>
    %432 = arith.mulf %431, %430 : vector<1x256xf32>
    %433 = arith.addf %427, %432 : vector<1x256xf32>
    %c1_163 = arith.constant 1 : index
    %c52_164 = arith.constant 52 : index
    %434 = vector.load %arg7[%c1_163, %c52_164] : memref<2x358xf32, #tpu.memory_space<vmem>>, vector<1x256xf32>
    %435 = vector.broadcast %429 : f32 to vector<1x256xf32>
    %436 = arith.mulf %435, %434 : vector<1x256xf32>
    %437 = arith.addf %433, %436 : vector<1x256xf32>
    %c32_165 = arith.constant 32 : index
    %438 = memref.load %arg4[%c32_165] : memref<98xf32, #tpu.memory_space<smem>>
    %c81_166 = arith.constant 81 : index
    %439 = memref.load %arg4[%c81_166] : memref<98xf32, #tpu.memory_space<smem>>
    %c0_167 = arith.constant 0 : index
    %c68 = arith.constant 68 : index
    %440 = vector.load %arg7[%c0_167, %c68] : memref<2x358xf32, #tpu.memory_space<vmem>>, vector<1x256xf32>
    %441 = vector.broadcast %438 : f32 to vector<1x256xf32>
    %442 = arith.mulf %441, %440 : vector<1x256xf32>
    %443 = arith.addf %437, %442 : vector<1x256xf32>
    %c1_168 = arith.constant 1 : index
    %c68_169 = arith.constant 68 : index
    %444 = vector.load %arg7[%c1_168, %c68_169] : memref<2x358xf32, #tpu.memory_space<vmem>>, vector<1x256xf32>
    %445 = vector.broadcast %439 : f32 to vector<1x256xf32>
    %446 = arith.mulf %445, %444 : vector<1x256xf32>
    %447 = arith.addf %443, %446 : vector<1x256xf32>
    %c39 = arith.constant 39 : index
    %448 = memref.load %arg4[%c39] : memref<98xf32, #tpu.memory_space<smem>>
    %c88 = arith.constant 88 : index
    %449 = memref.load %arg4[%c88] : memref<98xf32, #tpu.memory_space<smem>>
    %c0_170 = arith.constant 0 : index
    %c84_171 = arith.constant 84 : index
    %450 = vector.load %arg7[%c0_170, %c84_171] : memref<2x358xf32, #tpu.memory_space<vmem>>, vector<1x256xf32>
    %451 = vector.broadcast %448 : f32 to vector<1x256xf32>
    %452 = arith.mulf %451, %450 : vector<1x256xf32>
    %453 = arith.addf %447, %452 : vector<1x256xf32>
    %c1_172 = arith.constant 1 : index
    %c84_173 = arith.constant 84 : index
    %454 = vector.load %arg7[%c1_172, %c84_173] : memref<2x358xf32, #tpu.memory_space<vmem>>, vector<1x256xf32>
    %455 = vector.broadcast %449 : f32 to vector<1x256xf32>
    %456 = arith.mulf %455, %454 : vector<1x256xf32>
    %457 = arith.addf %453, %456 : vector<1x256xf32>
    %c46 = arith.constant 46 : index
    %458 = memref.load %arg4[%c46] : memref<98xf32, #tpu.memory_space<smem>>
    %c95 = arith.constant 95 : index
    %459 = memref.load %arg4[%c95] : memref<98xf32, #tpu.memory_space<smem>>
    %c0_174 = arith.constant 0 : index
    %c100 = arith.constant 100 : index
    %460 = vector.load %arg7[%c0_174, %c100] : memref<2x358xf32, #tpu.memory_space<vmem>>, vector<1x256xf32>
    %461 = vector.broadcast %458 : f32 to vector<1x256xf32>
    %462 = arith.mulf %461, %460 : vector<1x256xf32>
    %463 = arith.addf %457, %462 : vector<1x256xf32>
    %c1_175 = arith.constant 1 : index
    %c100_176 = arith.constant 100 : index
    %464 = vector.load %arg7[%c1_175, %c100_176] : memref<2x358xf32, #tpu.memory_space<vmem>>, vector<1x256xf32>
    %465 = vector.broadcast %459 : f32 to vector<1x256xf32>
    %466 = arith.mulf %465, %464 : vector<1x256xf32>
    %467 = arith.addf %463, %466 : vector<1x256xf32>
    %cst_177 = arith.constant 0.000000e+00 : f32
    %468 = vector.broadcast %cst_177 : f32 to vector<1x256xf32>
    %469 = arith.select %82, %467, %468 : vector<1x256xi1>, vector<1x256xf32>
    %470 = arith.addf %396, %469 : vector<1x256xf32>
    %cst_178 = arith.constant 0.000000e+00 : f32
    %471 = vector.broadcast %cst_178 : f32 to vector<1x256xf32>
    %c5 = arith.constant 5 : index
    %472 = memref.load %arg4[%c5] : memref<98xf32, #tpu.memory_space<smem>>
    %c54 = arith.constant 54 : index
    %473 = memref.load %arg4[%c54] : memref<98xf32, #tpu.memory_space<smem>>
    %c0_179 = arith.constant 0 : index
    %c5_180 = arith.constant 5 : index
    %474 = vector.load %arg7[%c0_179, %c5_180] : memref<2x358xf32, #tpu.memory_space<vmem>>, vector<1x256xf32>
    %475 = vector.broadcast %472 : f32 to vector<1x256xf32>
    %476 = arith.mulf %475, %474 : vector<1x256xf32>
    %477 = arith.addf %471, %476 : vector<1x256xf32>
    %c1_181 = arith.constant 1 : index
    %c5_182 = arith.constant 5 : index
    %478 = vector.load %arg7[%c1_181, %c5_182] : memref<2x358xf32, #tpu.memory_space<vmem>>, vector<1x256xf32>
    %479 = vector.broadcast %473 : f32 to vector<1x256xf32>
    %480 = arith.mulf %479, %478 : vector<1x256xf32>
    %481 = arith.addf %477, %480 : vector<1x256xf32>
    %c12 = arith.constant 12 : index
    %482 = memref.load %arg4[%c12] : memref<98xf32, #tpu.memory_space<smem>>
    %c61 = arith.constant 61 : index
    %483 = memref.load %arg4[%c61] : memref<98xf32, #tpu.memory_space<smem>>
    %c0_183 = arith.constant 0 : index
    %c21_184 = arith.constant 21 : index
    %484 = vector.load %arg7[%c0_183, %c21_184] : memref<2x358xf32, #tpu.memory_space<vmem>>, vector<1x256xf32>
    %485 = vector.broadcast %482 : f32 to vector<1x256xf32>
    %486 = arith.mulf %485, %484 : vector<1x256xf32>
    %487 = arith.addf %481, %486 : vector<1x256xf32>
    %c1_185 = arith.constant 1 : index
    %c21_186 = arith.constant 21 : index
    %488 = vector.load %arg7[%c1_185, %c21_186] : memref<2x358xf32, #tpu.memory_space<vmem>>, vector<1x256xf32>
    %489 = vector.broadcast %483 : f32 to vector<1x256xf32>
    %490 = arith.mulf %489, %488 : vector<1x256xf32>
    %491 = arith.addf %487, %490 : vector<1x256xf32>
    %c19_187 = arith.constant 19 : index
    %492 = memref.load %arg4[%c19_187] : memref<98xf32, #tpu.memory_space<smem>>
    %c68_188 = arith.constant 68 : index
    %493 = memref.load %arg4[%c68_188] : memref<98xf32, #tpu.memory_space<smem>>
    %c0_189 = arith.constant 0 : index
    %c37_190 = arith.constant 37 : index
    %494 = vector.load %arg7[%c0_189, %c37_190] : memref<2x358xf32, #tpu.memory_space<vmem>>, vector<1x256xf32>
    %495 = vector.broadcast %492 : f32 to vector<1x256xf32>
    %496 = arith.mulf %495, %494 : vector<1x256xf32>
    %497 = arith.addf %491, %496 : vector<1x256xf32>
    %c1_191 = arith.constant 1 : index
    %c37_192 = arith.constant 37 : index
    %498 = vector.load %arg7[%c1_191, %c37_192] : memref<2x358xf32, #tpu.memory_space<vmem>>, vector<1x256xf32>
    %499 = vector.broadcast %493 : f32 to vector<1x256xf32>
    %500 = arith.mulf %499, %498 : vector<1x256xf32>
    %501 = arith.addf %497, %500 : vector<1x256xf32>
    %c26 = arith.constant 26 : index
    %502 = memref.load %arg4[%c26] : memref<98xf32, #tpu.memory_space<smem>>
    %c75 = arith.constant 75 : index
    %503 = memref.load %arg4[%c75] : memref<98xf32, #tpu.memory_space<smem>>
    %c0_193 = arith.constant 0 : index
    %c53_194 = arith.constant 53 : index
    %504 = vector.load %arg7[%c0_193, %c53_194] : memref<2x358xf32, #tpu.memory_space<vmem>>, vector<1x256xf32>
    %505 = vector.broadcast %502 : f32 to vector<1x256xf32>
    %506 = arith.mulf %505, %504 : vector<1x256xf32>
    %507 = arith.addf %501, %506 : vector<1x256xf32>
    %c1_195 = arith.constant 1 : index
    %c53_196 = arith.constant 53 : index
    %508 = vector.load %arg7[%c1_195, %c53_196] : memref<2x358xf32, #tpu.memory_space<vmem>>, vector<1x256xf32>
    %509 = vector.broadcast %503 : f32 to vector<1x256xf32>
    %510 = arith.mulf %509, %508 : vector<1x256xf32>
    %511 = arith.addf %507, %510 : vector<1x256xf32>
    %c33_197 = arith.constant 33 : index
    %512 = memref.load %arg4[%c33_197] : memref<98xf32, #tpu.memory_space<smem>>
    %c82_198 = arith.constant 82 : index
    %513 = memref.load %arg4[%c82_198] : memref<98xf32, #tpu.memory_space<smem>>
    %c0_199 = arith.constant 0 : index
    %c69 = arith.constant 69 : index
    %514 = vector.load %arg7[%c0_199, %c69] : memref<2x358xf32, #tpu.memory_space<vmem>>, vector<1x256xf32>
    %515 = vector.broadcast %512 : f32 to vector<1x256xf32>
    %516 = arith.mulf %515, %514 : vector<1x256xf32>
    %517 = arith.addf %511, %516 : vector<1x256xf32>
    %c1_200 = arith.constant 1 : index
    %c69_201 = arith.constant 69 : index
    %518 = vector.load %arg7[%c1_200, %c69_201] : memref<2x358xf32, #tpu.memory_space<vmem>>, vector<1x256xf32>
    %519 = vector.broadcast %513 : f32 to vector<1x256xf32>
    %520 = arith.mulf %519, %518 : vector<1x256xf32>
    %521 = arith.addf %517, %520 : vector<1x256xf32>
    %c40 = arith.constant 40 : index
    %522 = memref.load %arg4[%c40] : memref<98xf32, #tpu.memory_space<smem>>
    %c89 = arith.constant 89 : index
    %523 = memref.load %arg4[%c89] : memref<98xf32, #tpu.memory_space<smem>>
    %c0_202 = arith.constant 0 : index
    %c85_203 = arith.constant 85 : index
    %524 = vector.load %arg7[%c0_202, %c85_203] : memref<2x358xf32, #tpu.memory_space<vmem>>, vector<1x256xf32>
    %525 = vector.broadcast %522 : f32 to vector<1x256xf32>
    %526 = arith.mulf %525, %524 : vector<1x256xf32>
    %527 = arith.addf %521, %526 : vector<1x256xf32>
    %c1_204 = arith.constant 1 : index
    %c85_205 = arith.constant 85 : index
    %528 = vector.load %arg7[%c1_204, %c85_205] : memref<2x358xf32, #tpu.memory_space<vmem>>, vector<1x256xf32>
    %529 = vector.broadcast %523 : f32 to vector<1x256xf32>
    %530 = arith.mulf %529, %528 : vector<1x256xf32>
    %531 = arith.addf %527, %530 : vector<1x256xf32>
    %c47 = arith.constant 47 : index
    %532 = memref.load %arg4[%c47] : memref<98xf32, #tpu.memory_space<smem>>
    %c96_206 = arith.constant 96 : index
    %533 = memref.load %arg4[%c96_206] : memref<98xf32, #tpu.memory_space<smem>>
    %c0_207 = arith.constant 0 : index
    %c101 = arith.constant 101 : index
    %534 = vector.load %arg7[%c0_207, %c101] : memref<2x358xf32, #tpu.memory_space<vmem>>, vector<1x256xf32>
    %535 = vector.broadcast %532 : f32 to vector<1x256xf32>
    %536 = arith.mulf %535, %534 : vector<1x256xf32>
    %537 = arith.addf %531, %536 : vector<1x256xf32>
    %c1_208 = arith.constant 1 : index
    %c101_209 = arith.constant 101 : index
    %538 = vector.load %arg7[%c1_208, %c101_209] : memref<2x358xf32, #tpu.memory_space<vmem>>, vector<1x256xf32>
    %539 = vector.broadcast %533 : f32 to vector<1x256xf32>
    %540 = arith.mulf %539, %538 : vector<1x256xf32>
    %541 = arith.addf %537, %540 : vector<1x256xf32>
    %cst_210 = arith.constant 0.000000e+00 : f32
    %542 = vector.broadcast %cst_210 : f32 to vector<1x256xf32>
    %543 = arith.select %91, %541, %542 : vector<1x256xi1>, vector<1x256xf32>
    %544 = arith.addf %470, %543 : vector<1x256xf32>
    %cst_211 = arith.constant 0.000000e+00 : f32
    %545 = vector.broadcast %cst_211 : f32 to vector<1x256xf32>
    %c6 = arith.constant 6 : index
    %546 = memref.load %arg4[%c6] : memref<98xf32, #tpu.memory_space<smem>>
    %c55 = arith.constant 55 : index
    %547 = memref.load %arg4[%c55] : memref<98xf32, #tpu.memory_space<smem>>
    %c0_212 = arith.constant 0 : index
    %c6_213 = arith.constant 6 : index
    %548 = vector.load %arg7[%c0_212, %c6_213] : memref<2x358xf32, #tpu.memory_space<vmem>>, vector<1x256xf32>
    %549 = vector.broadcast %546 : f32 to vector<1x256xf32>
    %550 = arith.mulf %549, %548 : vector<1x256xf32>
    %551 = arith.addf %545, %550 : vector<1x256xf32>
    %c1_214 = arith.constant 1 : index
    %c6_215 = arith.constant 6 : index
    %552 = vector.load %arg7[%c1_214, %c6_215] : memref<2x358xf32, #tpu.memory_space<vmem>>, vector<1x256xf32>
    %553 = vector.broadcast %547 : f32 to vector<1x256xf32>
    %554 = arith.mulf %553, %552 : vector<1x256xf32>
    %555 = arith.addf %551, %554 : vector<1x256xf32>
    %c13 = arith.constant 13 : index
    %556 = memref.load %arg4[%c13] : memref<98xf32, #tpu.memory_space<smem>>
    %c62 = arith.constant 62 : index
    %557 = memref.load %arg4[%c62] : memref<98xf32, #tpu.memory_space<smem>>
    %c0_216 = arith.constant 0 : index
    %c22_217 = arith.constant 22 : index
    %558 = vector.load %arg7[%c0_216, %c22_217] : memref<2x358xf32, #tpu.memory_space<vmem>>, vector<1x256xf32>
    %559 = vector.broadcast %556 : f32 to vector<1x256xf32>
    %560 = arith.mulf %559, %558 : vector<1x256xf32>
    %561 = arith.addf %555, %560 : vector<1x256xf32>
    %c1_218 = arith.constant 1 : index
    %c22_219 = arith.constant 22 : index
    %562 = vector.load %arg7[%c1_218, %c22_219] : memref<2x358xf32, #tpu.memory_space<vmem>>, vector<1x256xf32>
    %563 = vector.broadcast %557 : f32 to vector<1x256xf32>
    %564 = arith.mulf %563, %562 : vector<1x256xf32>
    %565 = arith.addf %561, %564 : vector<1x256xf32>
    %c20_220 = arith.constant 20 : index
    %566 = memref.load %arg4[%c20_220] : memref<98xf32, #tpu.memory_space<smem>>
    %c69_221 = arith.constant 69 : index
    %567 = memref.load %arg4[%c69_221] : memref<98xf32, #tpu.memory_space<smem>>
    %c0_222 = arith.constant 0 : index
    %c38_223 = arith.constant 38 : index
    %568 = vector.load %arg7[%c0_222, %c38_223] : memref<2x358xf32, #tpu.memory_space<vmem>>, vector<1x256xf32>
    %569 = vector.broadcast %566 : f32 to vector<1x256xf32>
    %570 = arith.mulf %569, %568 : vector<1x256xf32>
    %571 = arith.addf %565, %570 : vector<1x256xf32>
    %c1_224 = arith.constant 1 : index
    %c38_225 = arith.constant 38 : index
    %572 = vector.load %arg7[%c1_224, %c38_225] : memref<2x358xf32, #tpu.memory_space<vmem>>, vector<1x256xf32>
    %573 = vector.broadcast %567 : f32 to vector<1x256xf32>
    %574 = arith.mulf %573, %572 : vector<1x256xf32>
    %575 = arith.addf %571, %574 : vector<1x256xf32>
    %c27 = arith.constant 27 : index
    %576 = memref.load %arg4[%c27] : memref<98xf32, #tpu.memory_space<smem>>
    %c76 = arith.constant 76 : index
    %577 = memref.load %arg4[%c76] : memref<98xf32, #tpu.memory_space<smem>>
    %c0_226 = arith.constant 0 : index
    %c54_227 = arith.constant 54 : index
    %578 = vector.load %arg7[%c0_226, %c54_227] : memref<2x358xf32, #tpu.memory_space<vmem>>, vector<1x256xf32>
    %579 = vector.broadcast %576 : f32 to vector<1x256xf32>
    %580 = arith.mulf %579, %578 : vector<1x256xf32>
    %581 = arith.addf %575, %580 : vector<1x256xf32>
    %c1_228 = arith.constant 1 : index
    %c54_229 = arith.constant 54 : index
    %582 = vector.load %arg7[%c1_228, %c54_229] : memref<2x358xf32, #tpu.memory_space<vmem>>, vector<1x256xf32>
    %583 = vector.broadcast %577 : f32 to vector<1x256xf32>
    %584 = arith.mulf %583, %582 : vector<1x256xf32>
    %585 = arith.addf %581, %584 : vector<1x256xf32>
    %c34_230 = arith.constant 34 : index
    %586 = memref.load %arg4[%c34_230] : memref<98xf32, #tpu.memory_space<smem>>
    %c83_231 = arith.constant 83 : index
    %587 = memref.load %arg4[%c83_231] : memref<98xf32, #tpu.memory_space<smem>>
    %c0_232 = arith.constant 0 : index
    %c70_233 = arith.constant 70 : index
    %588 = vector.load %arg7[%c0_232, %c70_233] : memref<2x358xf32, #tpu.memory_space<vmem>>, vector<1x256xf32>
    %589 = vector.broadcast %586 : f32 to vector<1x256xf32>
    %590 = arith.mulf %589, %588 : vector<1x256xf32>
    %591 = arith.addf %585, %590 : vector<1x256xf32>
    %c1_234 = arith.constant 1 : index
    %c70_235 = arith.constant 70 : index
    %592 = vector.load %arg7[%c1_234, %c70_235] : memref<2x358xf32, #tpu.memory_space<vmem>>, vector<1x256xf32>
    %593 = vector.broadcast %587 : f32 to vector<1x256xf32>
    %594 = arith.mulf %593, %592 : vector<1x256xf32>
    %595 = arith.addf %591, %594 : vector<1x256xf32>
    %c41 = arith.constant 41 : index
    %596 = memref.load %arg4[%c41] : memref<98xf32, #tpu.memory_space<smem>>
    %c90 = arith.constant 90 : index
    %597 = memref.load %arg4[%c90] : memref<98xf32, #tpu.memory_space<smem>>
    %c0_236 = arith.constant 0 : index
    %c86_237 = arith.constant 86 : index
    %598 = vector.load %arg7[%c0_236, %c86_237] : memref<2x358xf32, #tpu.memory_space<vmem>>, vector<1x256xf32>
    %599 = vector.broadcast %596 : f32 to vector<1x256xf32>
    %600 = arith.mulf %599, %598 : vector<1x256xf32>
    %601 = arith.addf %595, %600 : vector<1x256xf32>
    %c1_238 = arith.constant 1 : index
    %c86_239 = arith.constant 86 : index
    %602 = vector.load %arg7[%c1_238, %c86_239] : memref<2x358xf32, #tpu.memory_space<vmem>>, vector<1x256xf32>
    %603 = vector.broadcast %597 : f32 to vector<1x256xf32>
    %604 = arith.mulf %603, %602 : vector<1x256xf32>
    %605 = arith.addf %601, %604 : vector<1x256xf32>
    %c48_240 = arith.constant 48 : index
    %606 = memref.load %arg4[%c48_240] : memref<98xf32, #tpu.memory_space<smem>>
    %c97_241 = arith.constant 97 : index
    %607 = memref.load %arg4[%c97_241] : memref<98xf32, #tpu.memory_space<smem>>
    %c0_242 = arith.constant 0 : index
    %c102 = arith.constant 102 : index
    %608 = vector.load %arg7[%c0_242, %c102] : memref<2x358xf32, #tpu.memory_space<vmem>>, vector<1x256xf32>
    %609 = vector.broadcast %606 : f32 to vector<1x256xf32>
    %610 = arith.mulf %609, %608 : vector<1x256xf32>
    %611 = arith.addf %605, %610 : vector<1x256xf32>
    %c1_243 = arith.constant 1 : index
    %c102_244 = arith.constant 102 : index
    %612 = vector.load %arg7[%c1_243, %c102_244] : memref<2x358xf32, #tpu.memory_space<vmem>>, vector<1x256xf32>
    %613 = vector.broadcast %607 : f32 to vector<1x256xf32>
    %614 = arith.mulf %613, %612 : vector<1x256xf32>
    %615 = arith.addf %611, %614 : vector<1x256xf32>
    %cst_245 = arith.constant 0.000000e+00 : f32
    %616 = vector.broadcast %cst_245 : f32 to vector<1x256xf32>
    %617 = arith.select %100, %615, %616 : vector<1x256xi1>, vector<1x256xf32>
    %618 = arith.addf %544, %617 : vector<1x256xf32>
    %619 = arith.negf %618 : vector<1x256xf32>
    %620 = math.exp %619 : vector<1x256xf32>
    %cst_246 = arith.constant 1.000000e+00 : f32
    %621 = vector.broadcast %cst_246 : f32 to vector<1x256xf32>
    %622 = arith.addf %621, %620 : vector<1x256xf32>
    %623 = arith.divf %621, %622 : vector<1x256xf32>
    %c0_247 = arith.constant 0 : index
    %c0_248 = arith.constant 0 : index
    %c0_249 = arith.constant 0 : index
    %624 = vector.load %arg1[%c0_247, %c0_248, %c0_249] : memref<1x32x256xf32, #tpu.memory_space<vmem>>, vector<1x32x256xf32>
    %625 = vector.shape_cast %624 : vector<1x32x256xf32> to vector<32x256xf32>
    %626 = vector.broadcast %31 : vector<32x1xf32> to vector<32x256xf32>
    %627 = arith.mulf %625, %626 : vector<32x256xf32>
    %628 = vector.broadcast %623 : vector<1x256xf32> to vector<32x256xf32>
    %629 = arith.mulf %627, %628 : vector<32x256xf32>
    %c0_250 = arith.constant 0 : index
    %c0_251 = arith.constant 0 : index
    %c0_252 = arith.constant 0 : index
    %630 = vector.load %arg6[%c0_250, %c0_251, %c0_252] : memref<1x32x256xf32, #tpu.memory_space<vmem>>, vector<1x32x256xf32>
    %631 = vector.shape_cast %630 : vector<1x32x256xf32> to vector<32x256xf32>
    %632 = vector.shape_cast %629 : vector<32x256xf32> to vector<1x32x256xf32>
    tpu.vector_store %arg6[%c0_250, %c0_251, %c0_252], %632 {strides = array<i32>} : memref<1x32x256xf32, #tpu.memory_space<vmem>>, vector<1x32x256xf32>,
    return
  }
  func.func @transform_0(%arg0: i32) -> (i32, i32, i32) {
    %c0_i32 = arith.constant 0 : i32
    %c0_i32_0 = arith.constant 0 : i32
    %c0_i32_1 = arith.constant 0 : i32
    return %arg0, %c0_i32, %c0_i32_0 : i32, i32, i32
  }
  func.func @transform_1(%arg0: i32) -> (i32, i32) {
    %c0_i32 = arith.constant 0 : i32
    %c0_i32_0 = arith.constant 0 : i32
    %c0_i32_1 = arith.constant 0 : i32
    return %c0_i32, %c0_i32_0 : i32, i32
  }
  func.func @transform_2(%arg0: i32) -> (i32, i32) {
    %c0_i32 = arith.constant 0 : i32
    %c0_i32_0 = arith.constant 0 : i32
    %c0_i32_1 = arith.constant 0 : i32
    return %c0_i32, %c0_i32_0 : i32, i32
  }
  func.func @transform_3(%arg0: i32) -> i32 {
    %c0_i32 = arith.constant 0 : i32
    %c0_i32_0 = arith.constant 0 : i32
    return %c0_i32 : i32
  }
  func.func @transform_4(%arg0: i32) -> i32 {
    %c0_i32 = arith.constant 0 : i32
    %c0_i32_0 = arith.constant 0 : i32
    return %c0_i32 : i32
  }
  func.func @transform_5(%arg0: i32) -> (i32, i32, i32) {
    %c0_i32 = arith.constant 0 : i32
    %c0_i32_0 = arith.constant 0 : i32
    %c0_i32_1 = arith.constant 0 : i32
    return %arg0, %c0_i32, %c0_i32_0 : i32, i32, i32
  }
}

</mosaic_0001>

<bundles_post_ra>
// kernel: cbam_pallas.1
= control target key start
LH: loop header
LB: loop body
LE: loop exit
PB: predicated region body
PF: predicated region fallthrough
CT: control target
= control target key end

     0   :  { %s2726_s0 = inlined_call_operand.vmem [shape: f32[2,32,256], index: 0, kind: input, shape index: {}]   ;;  %s2727_s1 = inlined_call_operand.vmem [shape: f32[32,2], index: 1, kind: input, shape index: {}]   ;;  %s2728_s2 = inlined_call_operand.vmem [shape: f32[32,2], index: 2, kind: input, shape index: {}]   ;;  %s2729_s3 = inlined_call_operand.vmem [shape: f32[98], index: 3, kind: input, shape index: {}]   ;;  %s2730_s4 = inlined_call_operand.<no memory space> [shape: f32[1], index: 4, kind: input, shape index: {}]   ;;  %s2731_s5 = inlined_call_operand.vmem [shape: f32[2,32,256], index: 5, kind: output, shape index: {}]  }
   0x1   :  { %10 = sst [smem:[#allocation3]] %s2730_s4 }
   0x2   :  { %11 = vsyncpa [#allocation5], 0  ;;  %s1981_s20 = smov 0  }
   0x3 LB: > { %s1729_s21 = sadd.s32 4294967295, %s1930_s20   ;;  %p1731_p0 = scmp.ge.s32.totalorder %s1930_s20, 1  ;;  %s1930_s20 = sphi %s1981_s20, %s17_s20  }
   0x4   : > { %p158_p1 = scmp.lt.s32.totalorder %s1930_s20, 3  ;;  %s177_s24 = sshll.u32 %s2729_s3, 4  ;;  %s178_s24 = int_to_ptr.vmem [resolvable:$true] %s177_s24 }
   0x5   : > { %p1855_p3 = scmp.eq.s32.totalorder %s1729_s21, 0  ;;  %s1905_s25 = scalar_lea.vmem %s178_s24, 16 }
   0x6   : > { %p1992_p2 = pnand %p1731_p0, %p158_p1  ;;  %p1906_p6 = scmp.ne.s32.totalorder %s178_s24, %s1905_s25 }
   0x7   : > { %p1913_p10 = scmp.lt.s32.totalorder %s178_s24, %s178_s24  ;;  %p1914_p11 = scmp.lt.s32.totalorder %s1905_s25, %s1905_s25 }
   0x8   : > { %p1851_p4 = pneg %p1992_p2 }
   0x9   : > { %p1915_p12 = por %p1914_p11, %p1913_p10 }
   0xa   : > { %p1852_p5 = pnand %p1855_p3, %p1851_p4 }
   0xc   : > { %p1907_p7 = pneg %p1852_p5 }
   0xe   : > { %p1908_p8 = pnand %p1907_p7, %p1906_p6 }
  0x10   : > { %p1909_p9 = pneg %p1908_p8 }
  0x12   : > { %p1916_p13 = pnand %p1915_p12, %p1909_p9 }
  0x14   : > { %1919 = shalt.err (!%p1916_p13)
}
  0x15   : > { %s1932_s26 = smov [#allocation4]   ;;  %201 = sbr.rel (%p1992_p2) target bundleno = 994 (0x3e2), region = 40 }
  0x16   : > { %1854 = dma.vmem_to_smem (!%p1852_p5), %s178_s24, 16, %s1932_s26, [#allocation5]  }
  0x1c   : > { %1925 = dma.done.wait (%p1855_p3), [#allocation5], 16  }
  0x1d   : > { %1927 = vsyncadd (%p1855_p3), [#allocation5], 4294967280 }
  0x1e   : > { %207 = sfence }
  0x1f   : > { %p230_p0 = scmp.lt.s32.totalorder %s1729_s21, 1  ;;  %v277_v19 = vld [vmem:[%s2727_s1] sm:$0xff]  ;;  %v278_v23 = vld [vmem:[%s2727_s1 + $0x8] sm:$0xff]  ;;  %v279_v24 = vld [vmem:[%s2727_s1 + $0x10] sm:$0xff]  ;;  %vm289_vm0 = vcmask 15360   ;;  %vm410_vm1 = vcmask 1041408  }
  0x20   : > { %v280_v30 = vld [vmem:[%s2727_s1 + $0x18] sm:$0xff]  ;;  %vm411_vm2 = vcmask 1043458   ;;  %vm413_vm3 = vcmask 832516   ;;  %s1935_s24 = smov 51   ;;  %vm436_vm8 = vcmask 416768   ;;  %s1746_s4 = sld [smem:[#allocation4 + $0x38]] }
  0x21   : > { %s2780_s21 = smov (!%p230_p0, %s1729_s21), 1  ;;  %vm412_vm4 = vmor %vm411_vm2, %vm410_vm1  ;;  %s1774_s25 = sld [smem:[#allocation4 + $0x3a]]  ;;  %vm542_vm10 = vcmask 916480   ;;  %vm564_vm11 = vcmask 785408   ;;  %vm585_vm12 = vcmask 654336   ;;  %vm606_vm13 = vcmask 523264  }
  0x22   : > { %s2732_s27 = sshll.u32 %s2780_s21, 6  ;;  %vm414_vm5 = vmor %vm413_vm3, %vm412_vm4  ;;  %s1748_s26 = sld [smem:[#allocation4 + $0x3f]]  ;;  %vm627_vm14 = vcmask 392192   ;;  %vm648_vm15 = vcmask 261120  }
  0x23   : > { %s2011_s30 = scalar_lea.vmem %s2726_s0, %s2732_s27  ;;  %s1762_s28 = sld [smem:[#allocation4 + $0x40]] }
  0x24   : > { %v2014_v0 = vld [vmem:[%s2011_s30 + $0x20] sm:$0xff]  ;;  %v2017_v1 = vld [vmem:[%s2011_s30 + $0x28] sm:$0xff]  ;;  %v2028_v5 = vld [vmem:[%s2011_s30 + $0x10] sm:$0xff]  ;;  %s1750_s29 = sld [smem:[#allocation4 + $0x46]]  ;;  %s1802_s6 = sld [smem:[#allocation4 + $0x3c]] }
  0x25   : > { %v2020_v2 = vld [vmem:[%s2011_s30] sm:$0xff]  ;;  %v254_v3 = vadd.f32 %v2017_v1, %v2014_v0  ;;  %v2025_v4 = vld [vmem:[%s2011_s30 + $0x8] sm:$0xff]  ;;  %v2031_v6 = vld [vmem:[%s2011_s30 + $0x18] sm:$0xff]  ;;  %v271_v15 = vmax.f32 %v2014_v0, %v2017_v1  ;;  %s2129_s7 = sld [smem:[#allocation4 + $0x4d]]  ;;  %s1936_s9 = smov 112  }
  0x26   : > { %v248_v7 = vadd.f32 %v2025_v4, %v2020_v2  ;;  %v265_v8 = vmax.f32 %v2020_v2, %v2025_v4  ;;  %v251_v9 = vadd.f32 %v2031_v6, %v2028_v5  ;;  %v2040_v10 = vld [vmem:[%s2011_s30 + $0x30] sm:$0xff]  ;;  %v2043_v11 = vld [vmem:[%s2011_s30 + $0x38] sm:$0xff]  ;;  %v268_v13 = vmax.f32 %v2028_v5, %v2031_v6  ;;  %s2131_s8 = sld [smem:[#allocation4 + $0x3d]]  ;;  %s2137_s10 = sld [smem:[#allocation4 + $0x39]] }
  0x27   : > { %255 = vadd.xlane.f32.xlu1 %v254_v3  ;;  %v257_v12 = vadd.f32 %v2043_v11, %v2040_v10  ;;  %v274_v14 = vmax.f32 %v2040_v10, %v2043_v11  ;;  %s2139_s11 = sld [smem:[#allocation4 + $0x42]]  ;;  %s2141_s12 = sld [smem:[#allocation4 + $0x3b]] }
  0x28   : > { %249 = vadd.xlane.f32.xlu0 %v248_v7  ;;  %s2143_s13 = sld [smem:[#allocation4 + $0x48]]  ;;  %s1937_s14 = smov 96  }
  0x29   : > { %s2147_s15 = sld [smem:[#allocation4 + $0x41]]  ;;  %s2149_s16 = sld [smem:[#allocation4 + $0x44]] }
  0x2a   : > { %s2151_s17 = sld [smem:[#allocation4 + $0x47]]  ;;  %s2155_s18 = sld [smem:[#allocation4 + $0x49]] }
  0x2b   : > { %266 = vmax.xlane.f32.xlu1 %v265_v8  ;;  %s2159_s19 = sld [smem:[#allocation4 + $0x1]]  ;;  %s2161_s22 = sld [smem:[#allocation4 + $0x32]] }
  0x2c   : > { %252 = vadd.xlane.f32.xlu0 %v251_v9  ;;  %s2733_s23 = smov 80   ;;  %s2187_s27 = sld [smem:[#allocation4 + $0x6]] }
  0x2f   : > { %258 = vadd.xlane.f32.xlu1 %v257_v12  ;;  %v282_v12 = vld [vmem:[%s2728_s2 + $0x8] sm:$0xff] }
  0x30   : > { %269 = vmax.xlane.f32.xlu0 %v268_v13  ;;  %v281_v13 = vld [vmem:[%s2728_s2] sm:$0xff] }
  0x33   : > { %275 = vmax.xlane.f32.xlu1 %v274_v14 }
  0x34   : > { %272 = vmax.xlane.f32.xlu0 %v271_v15  ;;  %v284_v15 = vld [vmem:[%s2728_s2 + $0x18] sm:$0xff] }
  0xb4   : > { %v256_v16 = vpop.xlane.xlu1 %255 }
  0xb5   : > { %v250_v17 = vpop.xlane.xlu0 %249  ;;  %v263_v20 = vmul.f32 0.00390625, %v256_v16  ;;  %v283_v16 = vld [vmem:[%s2728_s2 + $0x10] sm:$0xff] }
  0xb6   : > { %v261_v18 = vmul.f32 0.00390625, %v250_v17 }
  0xb7   : > { %v287_v29 = vmul.f32 %v279_v24, %v263_v20 }
  0xb8   : > { %v267_v21 = vpop.xlane.xlu1 %266  ;;  %v285_v25 = vmul.f32 %v277_v19, %v261_v18 }
  0xb9   : > { %v253_v22 = vpop.xlane.xlu0 %252  ;;  %v304_v34 = vmul.f32 %v277_v19, %v267_v21  ;;  %v293_v40 = vsel %vm289_vm0, %v287_v29, 0.0 }
  0xba   : > { %v262_v26 = vmul.f32 0.00390625, %v253_v22  ;;  %v290_v33 = vsel %vm289_vm0, %v285_v25, 0.0  ;;  %v1933_v25 = vmov 0.0  }
  0xbb   : > { %v308_v46 = vsel %vm289_vm0, %v304_v34, 0.0  ;;  %415 = vst.msk [vmem:[#allocation2] sm:$0x3f] %vm414_vm5, %v1933_v25  ;;  %vm979_vm5 = vcmask 1031168  }
  0xbc   : > { %v259_v27 = vpop.xlane.xlu1 %258  ;;  %v286_v28 = vmul.f32 %v278_v23, %v262_v26 }
  0xbd   : > { %v264_v31 = vmul.f32 0.00390625, %v259_v27  ;;  %v270_v32 = vpop.xlane.xlu0 %269 }
  0xbe   : > { %v291_v35 = vsel %vm289_vm0, %v286_v28, 0.0  ;;  %v305_v36 = vmul.f32 %v278_v23, %v270_v32 }
  0xbf   : > { %v292_v37 = vadd.f32 %v291_v35, %v290_v33  ;;  %v288_v38 = vmul.f32 %v280_v30, %v264_v31 }
  0xc0   : > { %v309_v39 = vsel %vm289_vm0, %v305_v36, 0.0  ;;  %v276_v41 = vpop.xlane.xlu1 %275 }
  0xc1   : > { %v294_v42 = vadd.f32 %v293_v40, %v292_v37  ;;  %v273_v43 = vpop.xlane.xlu0 %272  ;;  %v295_v44 = vsel %vm289_vm0, %v288_v38, 0.0  ;;  %v307_v45 = vmul.f32 %v280_v30, %v276_v41  ;;  %v310_v48 = vadd.f32 %v309_v39, %v308_v46 }
  0xc2   : > { %v306_v47 = vmul.f32 %v279_v24, %v273_v43 }
  0xc3   : > { %v296_v49 = vadd.f32 %v295_v44, %v294_v42  ;;  %v313_v51 = vsel %vm289_vm0, %v307_v45, 0.0 }
  0xc4   : > { %v311_v50 = vsel %vm289_vm0, %v306_v47, 0.0 }
  0xc5   : > { %v312_v52 = vadd.f32 %v311_v50, %v310_v48  ;;  %v297_v53 = vrot.slane %v296_v49, 4 }
  0xc7   : > { %v298_v54 = vadd.f32 %v297_v53, %v296_v49  ;;  %v314_v55 = vadd.f32 %v313_v51, %v312_v52 }
  0xc9   : > { %v299_v56 = vrot.slane %v298_v54, 2  ;;  %v315_v57 = vrot.slane %v314_v55, 4 }
  0xcb   : > { %v300_v58 = vadd.f32 %v299_v56, %v298_v54  ;;  %v316_v59 = vadd.f32 %v315_v57, %v314_v55 }
  0xcd   : > { %v301_v60 = vrot.slane %v300_v58, 1  ;;  %v317_v61 = vrot.slane %v316_v59, 2 }
  0xcf   : > { %v318_v62 = vadd.f32 %v317_v61, %v316_v59  ;;  %v302_v63 = vadd.f32 %v301_v60, %v300_v58 }
  0xd1   : > { %v319_v3 = vrot.slane %v318_v62, 1  ;;  %v303_v9 = vmax.f32 %v302_v63, 0.0 }
  0xd3   : > { %v320_v7 = vadd.f32 %v319_v3, %v318_v62 }
  0xd5   : > { %v321_v8 = vmax.f32 %v320_v7, 0.0  ;;  %v2735_v7 = vlaneseq }
  0xd7   : > { %v322_v14 = vadd.f32 %v321_v8, %v303_v9  ;;  %vm2118_vm6 = vcmp.ge.s32.totalorder %v2735_v7, 51  ;;  %vm441_vm7 = vcmp.lt.s32.totalorder %v2735_v7, 307 }
  0xd8   : > { %vm442_vm9 = vmand %vm2118_vm6, %vm441_vm7 }
  0xd9   : > { %v324_v17 = vmul.f32 %v322_v14, %v282_v12  ;;  %v323_v18 = vmul.f32 %v322_v14, %v281_v13  ;;  %v326_v21 = vmul.f32 %v322_v14, %v284_v15  ;;  %v325_v22 = vmul.f32 %v322_v14, %v283_v16 }
  0xdb   : > { %v330_v19 = vsel %vm289_vm0, %v324_v17, 0.0  ;;  %v327_v20 = vsel %vm289_vm0, %v323_v18, 0.0  ;;  %v336_v23 = vsel %vm289_vm0, %v326_v21, 0.0  ;;  %v333_v24 = vsel %vm289_vm0, %v325_v22, 0.0 }
  0xdc   : > { %331 = vadd.xlane.f32.xlu1 %v330_v19  ;;  %328 = vadd.xlane.f32.xlu0 %v327_v20  ;;  %v2114_v18 = vshrl.u32 %v2735_v7, 7  ;;  %vm823_vm0 = vcmask 1039360  }
  0xe0   : > { %337 = vadd.xlane.f32.xlu1 %v336_v23  ;;  %334 = vadd.xlane.f32.xlu0 %v333_v24 }
 0x169   : > { %v332_v26 = vpop.xlane.xlu1 %331  ;;  %v329_v27 = vpop.xlane.xlu0 %328 }
 0x16a   : > { %v1741_v28 = vmul.f32 -1.442695, %v332_v26  ;;  %v1740_v29 = vmul.f32 -1.442695, %v329_v27 }
 0x16c   : > { %1881 = vpow2.f32 %v1741_v28 }
 0x16d   : > { %1883 = vpow2.f32 %v1740_v29  ;;  %v338_v30 = vpop.xlane.xlu1 %337  ;;  %v335_v31 = vpop.xlane.xlu0 %334 }
 0x16e   : > { %v1743_v32 = vmul.f32 -1.442695, %v338_v30  ;;  %v1742_v33 = vmul.f32 -1.442695, %v335_v31 }
 0x170   : > { %1885 = vpow2.f32 %v1743_v32 }
 0x171   : > { %1887 = vpow2.f32 %v1742_v33 }
 0x176   : > { %v1882_v34 = vpop.eup %1881 }
 0x177   : > { %v1884_v35 = vpop.eup %1883  ;;  %v352_v36 = vadd.f32 1.0, %v1882_v34 }
 0x178   : > { %v351_v37 = vadd.f32 1.0, %v1884_v35 }
 0x179   : > { %1889 = vrcp.f32 %v352_v36 }
 0x17a   : > { %v1886_v38 = vpop.eup %1885  ;;  %1891 = vrcp.f32 %v351_v37 }
 0x17b   : > { %v1888_v39 = vpop.eup %1887  ;;  %v354_v40 = vadd.f32 1.0, %v1886_v38 }
 0x17c   : > { %v353_v41 = vadd.f32 1.0, %v1888_v39 }
 0x17d   : > { %1893 = vrcp.f32 %v354_v40 }
 0x17e   : > { %1895 = vrcp.f32 %v353_v41 }
 0x183   : > { %v2089_v42 = vpop.eup %1889 }
 0x184   : > { %2752 = vst [vmem:[#allocation7_spill] sm:$0xff] %v2089_v42  ;;  %v2091_v43 = vpop.eup %1891  ;;  %v365_v46 = vmul.f32 %v2089_v42, %v2028_v5  ;;  %v366_v47 = vmul.f32 %v2089_v42, %v2031_v6 }
 0x185   : > { %2753 = vst [vmem:[#allocation8_spill] sm:$0xff] %v2091_v43  ;;  %v363_v44 = vmul.f32 %v2091_v43, %v2020_v2  ;;  %v364_v45 = vmul.f32 %v2091_v43, %v2025_v4 }
 0x187   : > { %v2101_v48 = vpop.eup %1893  ;;  %v371_v5 = vadd.f32 %v365_v46, %v363_v44  ;;  %v380_v52 = vadd.f32 %v366_v47, %v364_v45 }
 0x188   : > { %2754 = vst [vmem:[#allocation9_spill] sm:$0xff] %v2101_v48  ;;  %v2103_v49 = vpop.eup %1895  ;;  %v369_v50 = vmul.f32 %v2101_v48, %v2040_v10  ;;  %v370_v51 = vmul.f32 %v2101_v48, %v2043_v11 }
 0x189   : > { %2755 = vst [vmem:[#allocation10_spill] sm:$0xff] %v2103_v49  ;;  %v367_v2 = vmul.f32 %v2103_v49, %v2014_v0  ;;  %v368_v4 = vmul.f32 %v2103_v49, %v2017_v1  ;;  %v1934_v0 = vmov 1966171168  }
 0x18a   : > { %v393_v53 = vmax.f32 %v365_v46, %v369_v50  ;;  %v402_v6 = vmax.f32 %v366_v47, %v370_v51  ;;  %v420_v3 = vunpack.c.l.s4 %v1934_v0 }
 0x18b   : > { %v392_v54 = vmax.f32 %v363_v44, %v367_v2  ;;  %v401_v55 = vmax.f32 %v364_v45, %v368_v4  ;;  %v372_v56 = vadd.f32 %v371_v5, %v367_v2  ;;  %v381_v57 = vadd.f32 %v380_v52, %v368_v4 }
 0x18c   : > { %v421_v17 = vunpack.c.0.s8 %v420_v3  ;;  %v851_v2 = vstv %s1774_s25  ;;  %s2169_s25 = sld [smem:[#allocation4 + $0x3]] }
 0x18d   : > { %v394_v58 = vmax.f32 %v392_v54, %v393_v53  ;;  %v403_v59 = vmax.f32 %v401_v55, %v402_v6  ;;  %v373_v10 = vadd.f32 %v372_v56, %v369_v50  ;;  %v382_v60 = vadd.f32 %v381_v57, %v370_v51 }
 0x18e   : > { %v424_v27 = vsub.s32 %v421_v17, %v2114_v18  ;;  %v547_v51 = vstv %s1746_s4  ;;  %v568_v53 = vstv %s1748_s26  ;;  %v715_v6 = vstv %s1762_s28  ;;  %s2167_s4 = sld [smem:[#allocation4 + $0x33]]  ;;  %s2171_s26 = sld [smem:[#allocation4 + $0x34]] }
 0x18f   : > { %v395_v61 = vrot.slane %v394_v58, 4  ;;  %v404_v11 = vrot.slane %v403_v59, 4  ;;  %v374_v62 = vrot.slane %v373_v10, 4  ;;  %v383_v63 = vrot.slane %v382_v60, 4  ;;  %s2175_s28 = sld [smem:[#allocation4 + $0x4]] }
 0x190   : > { %v589_v56 = vstv %s1750_s29  ;;  %v1161_v57 = vstv %s1802_s6  ;;  %s2177_s29 = sld [smem:[#allocation4 + $0x35]] }
 0x191   : > { %v396_v1 = vmax.f32 %v394_v58, %v395_v61  ;;  %v405_v8 = vmax.f32 %v403_v59, %v404_v11  ;;  %v375_v9 = vadd.f32 %v374_v62, %v373_v10  ;;  %v384_v12 = vadd.f32 %v383_v63, %v382_v60  ;;  %s2181_s6 = sld [smem:[#allocation4 + $0x5]] }
 0x192   : > { %v610_v10 = vstv %s2129_s7  ;;  %v1317_v60 = vstv %s2131_s8  ;;  %v695_v62 = vstv %s2137_s10  ;;  %v1027_v63 = vstv %s2139_s11  ;;  %s2183_s7 = sld [smem:[#allocation4 + $0x36]]  ;;  %s1939_s8 = smov 64  }
 0x193   : > { %v397_v13 = vrot.slane %v396_v1, 2  ;;  %v406_v14 = vrot.slane %v405_v8, 2  ;;  %v376_v15 = vrot.slane %v375_v9, 2  ;;  %v385_v16 = vrot.slane %v384_v12, 2  ;;  %s2211_s10 = sld [smem:[#allocation4 + $0x43]]  ;;  %s2213_s11 = sld [smem:[#allocation4 + $0x4f]] }
 0x195   : > { %v398_v19 = vmax.f32 %v396_v1, %v397_v13  ;;  %v407_v20 = vmax.f32 %v405_v8, %v406_v14  ;;  %v377_v21 = vadd.f32 %v376_v15, %v375_v9  ;;  %v386_v22 = vadd.f32 %v385_v16, %v384_v12 }
 0x196   : > { %v1007_v1 = vstv %s2141_s12  ;;  %v891_v8 = vstv %s2143_s13  ;;  %v871_v9 = vstv %s2147_s15  ;;  %v1337_v12 = vstv %s2149_s16  ;;  %s2758_s12 = smov 80   ;;  %s2232_s13 = sld [smem:[#allocation4 + $0x3e]] }
 0x197   : > { %v399_v23 = vrot.slane %v398_v19, 1  ;;  %v408_v24 = vrot.slane %v407_v20, 1  ;;  %v378_v25 = vrot.slane %v377_v21, 1  ;;  %v387_v26 = vrot.slane %v386_v22, 1  ;;  %s1766_s15 = sld [smem:[#allocation4 + $0x4e]]  ;;  %s1794_s16 = sld [smem:[#allocation4 + $0x50]] }
 0x198   : > { %v735_v13 = vstv %s2151_s17  ;;  %v1047_v14 = vstv %s2155_s18  ;;  %v678_v15 = vstv %s2159_s19  ;;  %v681_v16 = vstv %s2161_s22  ;;  %s1806_s17 = sld [smem:[#allocation4 + $0x4a]]  ;;  %s1782_s18 = sld [smem:[#allocation4 + $0x56]] }
 0x199   : > { %v400_v28 = vmax.f32 %v398_v19, %v399_v23  ;;  %v409_v29 = vmax.f32 %v407_v20, %v408_v24  ;;  %v379_v30 = vadd.f32 %v378_v25, %v377_v21  ;;  %v388_v31 = vadd.f32 %v387_v26, %v386_v22  ;;  %s1832_s19 = sld [smem:[#allocation4 + $0x45]]  ;;  %s1822_s22 = sld [smem:[#allocation4 + $0x52]] }
 0x19a   : > { %v837_v19 = vstv %s2167_s4  ;;  %v990_v23 = vstv %s2169_s25  ;;  %v993_v24 = vstv %s2171_s26  ;;  %v1144_v25 = vstv %s2175_s28  ;;  %s1808_s4 = sld [smem:[#allocation4 + $0x51]]  ;;  %s1810_s25 = sld [smem:[#allocation4 + $0x58]] }
 0x19b   : > { %v446_v32 = vcombine.low %v400_v28, %v409_v29  ;;  %v390_v33 = vmul.f32 0.03125, %v379_v30  ;;  %v391_v34 = vmul.f32 0.03125, %v388_v31  ;;  %v1147_v26 = vstv %s2177_s29  ;;  %s1940_s26 = smov 48   ;;  %s1834_s28 = sld [smem:[#allocation4 + $0x4c]] }
 0x19c   : > { %v1303_v28 = vstv %s2183_s7  ;;  %v1456_v30 = vstv %s2187_s27  ;;  %s2234_s27 = sld [smem:[#allocation4 + $0x4b]]  ;;  %s1812_s7 = sld [smem:[#allocation4 + $0x5f]] }
 0x19d   : > { %v453_v35 = vrot.slane %v446_v32, %v424_v27  ;;  %v418_v36 = vcombine.low %v390_v33, %v391_v34  ;;  %s1836_s29 = sld [smem:[#allocation4 + $0x53]] }
 0x19f   : > { %v460_v37 = vrot.slane %v453_v35, %v424_v27  ;;  %v425_v38 = vrot.slane %v418_v36, %v424_v27 }
 0x1a1   : > { %461 = vrot.lane.b32.xlu1 %v460_v37, %s1935_s24  ;;  %v432_v39 = vrot.slane %v425_v38, %v424_v27  ;;  %v1300_v27 = vstv %s2181_s6  ;;  %s1770_s6 = sld [smem:[#allocation4 + $0x5c]] }
 0x1a3   : > { %433 = vrot.lane.b32.xlu0 %v432_v39, %s1935_s24  ;;  %s2165_s24 = sld [smem:[#allocation4 + $0x2]] }
 0x1a9   : > { %v834_v17 = vstv %s2165_s24  ;;  %s1796_s24 = sld [smem:[#allocation4 + $0x57]] }
 0x213   : > { %v462_v41 = vpop.permute.xlu1 %461 }
 0x214   : > { %v463_v44 = vrot.slane %v462_v41, 7 }
 0x215   : > { %v434_v45 = vpop.permute.xlu0 %433 }
 0x216   : > { %v464_v46 = vsel %vm436_vm8, %v463_v44, %v462_v41  ;;  %v435_v47 = vrot.slane %v434_v45, 7 }
 0x217   : > { %467 = vst.msk [vmem:[#allocation2 + $0x1] ss:$2 sm:$0x7] %vm442_vm9, %v464_v46 }
 0x218   : > { %v437_v50 = vsel %vm436_vm8, %v435_v47, %v434_v45  ;;  %vm1135_vm8 = vcmask 1022976  }
 0x219   : > { %443 = vst.msk [vmem:[#allocation2] ss:$2 sm:$0x7] %vm442_vm9, %v437_v50  ;;  %vm1289_vm9 = vcmask 1014784  }
 0x21e   : > { %v2125_v4 = vld [vmem:[#allocation2 + $0x1] ss:$2 sm:$0x7] }
 0x21f   : > { %v548_v5 = vmul.f32 %v547_v51, %v2125_v4  ;;  %v852_v52 = vmul.f32 %v851_v2, %v2125_v4  ;;  %v569_v54 = vmul.f32 %v568_v53, %v2125_v4  ;;  %v716_v55 = vmul.f32 %v715_v6, %v2125_v4 }
 0x220   : > { %v590_v58 = vmul.f32 %v589_v56, %v2125_v4  ;;  %v1162_v59 = vmul.f32 %v1161_v57, %v2125_v4  ;;  %v611_v61 = vmul.f32 %v610_v10, %v2125_v4  ;;  %v1318_v11 = vmul.f32 %v1317_v60, %v2125_v4  ;;  %v2205_v20 = vld [vmem:[#allocation2] ss:$2 sm:$0x7] }
 0x221   : > { %550 = vrot.lane.b32.xlu1 %v548_v5, %s1936_s9  ;;  %854 = vrot.lane.b32.xlu0 %v852_v52, %s1936_s9  ;;  %v696_v0 = vmul.f32 %v695_v62, %v2125_v4  ;;  %v1028_v3 = vmul.f32 %v1027_v63, %v2125_v4  ;;  %v1008_v21 = vmul.f32 %v1007_v1, %v2125_v4  ;;  %v1181_v6 = vstv %s2211_s10  ;;  %s1784_s10 = sld [smem:[#allocation4 + $0x5d]] }
 0x222   : > { %v892_v22 = vmul.f32 %v891_v8, %v2125_v4  ;;  %v872_v29 = vmul.f32 %v871_v9, %v2125_v4  ;;  %v679_v32 = vmul.f32 %v678_v15, %v2205_v20  ;;  %v682_v33 = vmul.f32 %v681_v16, %v2125_v4 }
 0x223   : > { %v835_v34 = vmul.f32 %v834_v17, %v2205_v20  ;;  %v838_v35 = vmul.f32 %v837_v19, %v2125_v4  ;;  %v1338_v36 = vmul.f32 %v1337_v12, %v2125_v4  ;;  %v991_v37 = vmul.f32 %v990_v23, %v2205_v20 }
 0x224   : > { %v994_v38 = vmul.f32 %v993_v24, %v2125_v4  ;;  %v1145_v39 = vmul.f32 %v1144_v25, %v2205_v20  ;;  %v2236_v40 = vadd.f32 %v682_v33, %v679_v32  ;;  %v1148_v44 = vmul.f32 %v1147_v26, %v2125_v4 }
 0x225   : > { %571 = vrot.lane.b32.xlu1 %v569_v54, %s1937_s14  ;;  %718 = vrot.lane.b32.xlu0 %v716_v55, %s1937_s14  ;;  %v2238_v41 = vadd.f32 %v838_v35, %v835_v34  ;;  %v1301_v45 = vmul.f32 %v1300_v27, %v2205_v20  ;;  %v1304_v47 = vmul.f32 %v1303_v28, %v2125_v4  ;;  %v911_v54 = vstv %s2213_s11  ;;  %s1838_s11 = sld [smem:[#allocation4 + $0x5a]] }
 0x226   : > { %v2244_v46 = vadd.f32 %v994_v38, %v991_v37  ;;  %v1457_v50 = vmul.f32 %v1456_v30, %v2205_v20  ;;  %v2248_v51 = vadd.f32 %v1148_v44, %v1145_v39  ;;  %v736_v5 = vmul.f32 %v735_v13, %v2125_v4 }
 0x227   : > { %v1048_v52 = vmul.f32 %v1047_v14, %v2125_v4  ;;  %v2253_v53 = vadd.f32 %v1304_v47, %v1301_v45  ;;  %v1182_v56 = vmul.f32 %v1181_v6, %v2125_v4  ;;  %v912_v57 = vmul.f32 %v911_v54, %v2125_v4 }
 0x228   : > { %v1493_v9 = vstv %s1832_s19  ;;  %v1377_v12 = vstv %s1822_s22  ;;  %v1087_v16 = vstv %s1796_s24  ;;  %v1513_v25 = vstv %s1834_s28  ;;  %s1751_s19 = sld [smem:[#allocation4 + $0x1c]]  ;;  %s1759_s22 = sld [smem:[#allocation4 + $0x8]] }
 0x229   : > { %592 = vrot.lane.b32.xlu1 %v590_v58, %s2733_s23  ;;  %1164 = vrot.lane.b32.xlu0 %v1162_v59, %s1936_s9  ;;  %s2189_s23 = sld [smem:[#allocation4 + $0x37]]  ;;  %v1473_v58 = vstv %s2232_s13  ;;  %v1357_v59 = vstv %s2234_s27  ;;  %v1494_v13 = vmul.f32 %v1493_v9, %v2125_v4  ;;  %v1378_v14 = vmul.f32 %v1377_v12, %v2125_v4  ;;  %s1824_s13 = sld [smem:[#allocation4 + $0x59]] }
 0x22a   : > { %v1474_v10 = vmul.f32 %v1473_v58, %v2125_v4  ;;  %v1358_v60 = vmul.f32 %v1357_v59, %v2125_v4  ;;  %v1088_v19 = vmul.f32 %v1087_v16, %v2125_v4  ;;  %v1533_v26 = vstv %s1836_s29  ;;  %s1747_s27 = sld [smem:[#allocation4 + $0xe]]  ;;  %s1773_s24 = sld [smem:[#allocation4 + $0x9]] }
 0x22b   : > { %v1514_v27 = vmul.f32 %v1513_v25, %v2125_v4  ;;  %v1534_v28 = vmul.f32 %v1533_v26, %v2125_v4  ;;  %v1261_v30 = vstv %s1812_s7  ;;  %v951_v33 = vstv %s1784_s10  ;;  %s1787_s28 = sld [smem:[#allocation4 + $0xa]]  ;;  %s1763_s29 = sld [smem:[#allocation4 + $0x16]] }
 0x22c   : > { %v1262_v32 = vmul.f32 %v1261_v30, %v2125_v4  ;;  %v1553_v34 = vstv %s1838_s11  ;;  %v952_v35 = vmul.f32 %v951_v33, %v2125_v4  ;;  %s1789_s7 = sld [smem:[#allocation4 + $0x11]]  ;;  %s1815_s10 = sld [smem:[#allocation4 + $0xc]] }
 0x22d   : > { %613 = vrot.lane.b32.xlu1 %v611_v61, %s1939_s8  ;;  %1320 = vrot.lane.b32.xlu0 %v1318_v11, %s1936_s9  ;;  %v755_v61 = vstv %s1766_s15  ;;  %v1067_v11 = vstv %s1794_s16  ;;  %s1798_s15 = sld [smem:[#allocation4 + $0x5e]]  ;;  %s1749_s16 = sld [smem:[#allocation4 + $0x15]] }
 0x22e   : > { %v756_v62 = vmul.f32 %v755_v61, %v2125_v4  ;;  %v1068_v63 = vmul.f32 %v1067_v11, %v2125_v4  ;;  %s1777_s11 = sld [smem:[#allocation4 + $0x17]] }
 0x22f   : > { %v1459_v31 = vstv %s2189_s23  ;;  %s1768_s23 = sld [smem:[#allocation4 + $0x55]]  ;;  %v1397_v37 = vstv %s1824_s13  ;;  %s1803_s13 = sld [smem:[#allocation4 + $0x12]] }
 0x230   : > { %v1460_v2 = vmul.f32 %v1459_v31, %v2125_v4  ;;  %v558_v38 = vstv %s1747_s27  ;;  %v1398_v39 = vmul.f32 %v1397_v37, %v2125_v4  ;;  %s1817_s27 = sld [smem:[#allocation4 + $0x13]] }
 0x231   : > { %698 = vrot.lane.b32.xlu1 %v696_v0, %s1936_s9  ;;  %1030 = vrot.lane.b32.xlu0 %v1028_v3, %s1937_s14  ;;  %v1201_v0 = vstv %s1806_s17  ;;  %v931_v3 = vstv %s1782_s18  ;;  %s1941_s17 = smov 32   ;;  %s1826_s18 = sld [smem:[#allocation4 + $0x60]]  ;;  %v559_v44 = vmul.f32 %v558_v38, %v2205_v20 }
 0x232   : > { %v2257_v55 = vadd.f32 %v1460_v2, %v1457_v50  ;;  %v1202_v1 = vmul.f32 %v1201_v0, %v2125_v4  ;;  %v932_v8 = vmul.f32 %v931_v3, %v2125_v4 }
 0x233   : > { %v1107_v45 = vstv %s1798_s15  ;;  %v579_v47 = vstv %s1749_s16  ;;  %s1829_s15 = sld [smem:[#allocation4 + $0xd]]  ;;  %s1791_s16 = sld [smem:[#allocation4 + $0x18]] }
 0x234   : > { %v1108_v50 = vmul.f32 %v1107_v45, %v2125_v4  ;;  %v580_v2 = vmul.f32 %v579_v47, %v2205_v20 }
 0x235   : > { %1010 = vrot.lane.b32.xlu1 %v1008_v21, %s1936_s9  ;;  %894 = vrot.lane.b32.xlu0 %v892_v22, %s2758_s12  ;;  %v775_v15 = vstv %s1768_s23  ;;  %v1221_v21 = vstv %s1808_s4  ;;  %s1745_s23 = sld [smem:[#allocation4 + $0x7]] }
 0x236   : > { %v776_v17 = vmul.f32 %v775_v15, %v2125_v4  ;;  %v1241_v22 = vstv %s1810_s25  ;;  %v1222_v23 = vmul.f32 %v1221_v21, %v2125_v4  ;;  %s1761_s4 = sld [smem:[#allocation4 + $0xf]]  ;;  %s1801_s25 = sld [smem:[#allocation4 + $0xb]] }
 0x237   : > { %v1242_v24 = vmul.f32 %v1241_v22, %v2125_v4 }
 0x239   : > { %874 = vrot.lane.b32.xlu1 %v872_v29, %s1937_s14  ;;  %1340 = vrot.lane.b32.xlu0 %v1338_v36, %s1937_s14  ;;  %v795_v29 = vstv %s1770_s6  ;;  %v1554_v36 = vmul.f32 %v1553_v34, %v2125_v4  ;;  %s1775_s6 = sld [smem:[#allocation4 + $0x10]] }
 0x23a   : > { %v796_v31 = vmul.f32 %v795_v29, %v2125_v4 }
 0x23d   : > { %738 = vrot.lane.b32.xlu1 %v736_v5, %s2758_s12  ;;  %1050 = vrot.lane.b32.xlu0 %v1048_v52, %s2758_s12  ;;  %v1417_v5 = vstv %s1826_s18  ;;  %v600_v52 = vstv %s1751_s19  ;;  %s1765_s18 = sld [smem:[#allocation4 + $0x1d]]  ;;  %s1779_s19 = sld [smem:[#allocation4 + $0x1e]] }
 0x23e   : > { %v1418_v6 = vmul.f32 %v1417_v5, %v2125_v4  ;;  %v601_v54 = vmul.f32 %v600_v52, %v2205_v20 }
 0x241   : > { %1184 = vrot.lane.b32.xlu1 %v1182_v56, %s1937_s14  ;;  %914 = vrot.lane.b32.xlu0 %v912_v57, %s1939_s8  ;;  %v686_v56 = vstv %s1759_s22  ;;  %v536_v57 = vstv %s1745_s23  ;;  %s1805_s22 = sld [smem:[#allocation4 + $0x19]]  ;;  %s1819_s23 = sld [smem:[#allocation4 + $0x1a]] }
 0x242   : > { %v687_v58 = vmul.f32 %v686_v56, %v2205_v20  ;;  %v537_v59 = vmul.f32 %v536_v57, %v2205_v20 }
 0x245   : > { %1476 = vrot.lane.b32.xlu1 %v1474_v10, %s1936_s9  ;;  %1360 = vrot.lane.b32.xlu0 %v1358_v60, %s2758_s12  ;;  %v842_v10 = vstv %s1773_s24  ;;  %v706_v60 = vstv %s1761_s4  ;;  %s1831_s24 = sld [smem:[#allocation4 + $0x14]]  ;;  %s1793_s4 = sld [smem:[#allocation4 + $0x1f]] }
 0x246   : > { %v843_v61 = vmul.f32 %v842_v10, %v2205_v20  ;;  %v707_v11 = vmul.f32 %v706_v60, %v2205_v20 }
 0x247   : > { %v1348_v37 = vstv %s1819_s23  ;;  %s1755_s23 = sld [smem:[#allocation4 + $0x2a]] }
 0x248   : > { %v1349_v45 = vmul.f32 %v1348_v37, %v2205_v20 }
 0x249   : > { %758 = vrot.lane.b32.xlu1 %v756_v62, %s1939_s8  ;;  %1070 = vrot.lane.b32.xlu0 %v1068_v63, %s1939_s8  ;;  %v1152_v62 = vstv %s1801_s25  ;;  %v998_v63 = vstv %s1787_s28  ;;  %s1767_s25 = sld [smem:[#allocation4 + $0x24]]  ;;  %s1807_s28 = sld [smem:[#allocation4 + $0x20]] }
 0x24a   : > { %v1153_v0 = vmul.f32 %v1152_v62, %v2205_v20  ;;  %v999_v3 = vmul.f32 %v998_v63, %v2205_v20 }
 0x24b   : > { %v1484_v38 = vstv %s1831_s24  ;;  %s1840_s24 = sld [smem:[#allocation4 + $0x61]] }
 0x24c   : > { %v1485_v47 = vmul.f32 %v1484_v38, %v2205_v20 }
 0x24d   : > { %1204 = vrot.lane.b32.xlu1 %v1202_v1, %s2758_s12  ;;  %934 = vrot.lane.b32.xlu0 %v932_v8, %s1940_s26  ;;  %v726_v1 = vstv %s1763_s29  ;;  %v862_v8 = vstv %s1775_s6  ;;  %s1821_s29 = sld [smem:[#allocation4 + $0x21]]  ;;  %s1833_s6 = sld [smem:[#allocation4 + $0x1b]] }
 0x24e   : > { %v727_v9 = vmul.f32 %v726_v1, %v2205_v20  ;;  %v863_v12 = vmul.f32 %v862_v8, %v2205_v20 }
 0x24f   : > { %v1212_v57 = vstv %s1807_s28  ;;  %s1944_s28 = smov 125  }
 0x250   : > { %v1213_v60 = vmul.f32 %v1212_v57, %v2205_v20 }
 0x251   : > { %1496 = vrot.lane.b32.xlu1 %v1494_v13, %s1937_s14  ;;  %1380 = vrot.lane.b32.xlu0 %v1378_v14, %s1939_s8  ;;  %v1018_v13 = vstv %s1789_s7  ;;  %v1308_v14 = vstv %s1815_s10  ;;  %s1795_s7 = sld [smem:[#allocation4 + $0x26]]  ;;  %s1769_s10 = sld [smem:[#allocation4 + $0x2b]] }
 0x252   : > { %v1019_v15 = vmul.f32 %v1018_v13, %v2205_v20  ;;  %v1309_v16 = vmul.f32 %v1308_v14, %v2205_v20 }
 0x255   : > { %778 = vrot.lane.b32.xlu1 %v776_v17, %s1940_s26  ;;  %1090 = vrot.lane.b32.xlu0 %v1088_v19, %s1940_s26  ;;  %v882_v17 = vstv %s1777_s11  ;;  %v1172_v19 = vstv %s1803_s13  ;;  %s1809_s11 = sld [smem:[#allocation4 + $0x27]]  ;;  %s1811_s13 = sld [smem:[#allocation4 + $0x2e]] }
 0x256   : > { %v883_v21 = vmul.f32 %v882_v17, %v2205_v20  ;;  %v1173_v22 = vmul.f32 %v1172_v19, %v2205_v20 }
 0x257   : > { %v1078_v1 = vstv %s1795_s7  ;;  %v786_v8 = vstv %s1769_s10  ;;  %s1947_s7 = smov 122   ;;  %s2686_s10 = sld [smem:[#allocation3]] }
 0x258   : > { %v1079_v13 = vmul.f32 %v1078_v1, %v2205_v20  ;;  %v787_v14 = vmul.f32 %v786_v8, %v2205_v20 }
 0x259   : > { %1224 = vrot.lane.b32.xlu1 %v1222_v23, %s1939_s8  ;;  %1244 = vrot.lane.b32.xlu0 %v1242_v24, %s1940_s26  ;;  %v1328_v23 = vstv %s1817_s27  ;;  %v1464_v24 = vstv %s1829_s15  ;;  %s1835_s27 = sld [smem:[#allocation4 + $0x22]]  ;;  %s1837_s15 = sld [smem:[#allocation4 + $0x29]] }
 0x25a   : > { %v1329_v25 = vmul.f32 %v1328_v23, %v2205_v20  ;;  %v1465_v26 = vmul.f32 %v1464_v24, %v2205_v20 }
 0x25b   : > { %v1252_v23 = vstv %s1811_s13 }
 0x25d   : > { %1516 = vrot.lane.b32.xlu1 %v1514_v27, %s2758_s12  ;;  %1536 = vrot.lane.b32.xlu0 %v1534_v28, %s1939_s8  ;;  %v1038_v27 = vstv %s1791_s16  ;;  %v746_v28 = vstv %s1765_s18  ;;  %s1823_s16 = sld [smem:[#allocation4 + $0x28]]  ;;  %s1797_s18 = sld [smem:[#allocation4 + $0x2d]] }
 0x25e   : > { %v1039_v29 = vmul.f32 %v1038_v27, %v2205_v20  ;;  %v747_v30 = vmul.f32 %v746_v28, %v2205_v20  ;;  %v1253_v27 = vmul.f32 %v1252_v23, %v2205_v20 }
 0x25f   : > { %v1524_v24 = vstv %s1835_s27 }
 0x260   : > { %v1525_v28 = vmul.f32 %v1524_v24, %v2205_v20 }
 0x261   : > { %798 = vrot.lane.b32.xlu1 %v796_v31, %s1941_s17  ;;  %1264 = vrot.lane.b32.xlu0 %v1262_v32, %s1941_s17  ;;  %v902_v31 = vstv %s1779_s19  ;;  %v1192_v32 = vstv %s1805_s22  ;;  %s1753_s19 = sld [smem:[#allocation4 + $0x23]]  ;;  %s1825_s22 = sld [smem:[#allocation4 + $0x2f]] }
 0x263   : > { %v1098_v38 = vstv %s1797_s18 }
 0x265   : > { %954 = vrot.lane.b32.xlu1 %v952_v35, %s1941_s17  ;;  %1556 = vrot.lane.b32.xlu0 %v1554_v36, %s1940_s26  ;;  %v903_v35 = vmul.f32 %v902_v31, %v2205_v20  ;;  %v1193_v36 = vmul.f32 %v1192_v32, %v2205_v20 }
 0x269   : > { %1400 = vrot.lane.b32.xlu1 %v1398_v39, %s1940_s26  ;;  %561 = vrot.lane.b32.xlu0 %v559_v44, %s1937_s14 }
 0x26d   : > { %1110 = vrot.lane.b32.xlu1 %v1108_v50, %s1941_s17  ;;  %582 = vrot.lane.b32.xlu0 %v580_v2, %s2758_s12  ;;  %v1058_v50 = vstv %s1793_s4  ;;  %v766_v2 = vstv %s1767_s25  ;;  %s1756_s4 = sld [smem:[#allocation4 + $0x5b]]  ;;  %s1942_s25 = smov 127  }
 0x271   : > { %1420 = vrot.lane.b32.xlu1 %v1418_v6, %s1941_s17  ;;  %603 = vrot.lane.b32.xlu0 %v601_v54, %s1939_s8  ;;  %v1059_v6 = vmul.f32 %v1058_v50, %v2205_v20  ;;  %v767_v54 = vmul.f32 %v766_v2, %v2205_v20  ;;  %v1099_v2 = vmul.f32 %v1098_v38, %v2205_v20 }
 0x275   : > { %689 = vrot.lane.b32.xlu0 %v687_v58, %s1936_s9  ;;  %539 = vrot.lane.b32.xlu1 %v537_v59, %s1936_s9 }
 0x279   : > { %845 = vrot.lane.b32.xlu0 %v843_v61, %s1936_s9  ;;  %709 = vrot.lane.b32.xlu1 %v707_v11, %s1937_s14  ;;  %v1368_v61 = vstv %s1821_s29  ;;  %v1504_v11 = vstv %s1833_s6  ;;  %s1945_s29 = smov 124   ;;  %s1946_s6 = smov 123  }
 0x27d   : > { %1155 = vrot.lane.b32.xlu0 %v1153_v0, %s1936_s9  ;;  %1001 = vrot.lane.b32.xlu1 %v999_v3, %s1936_s9  ;;  %v1369_v0 = vmul.f32 %v1368_v61, %v2205_v20  ;;  %v1505_v3 = vmul.f32 %v1504_v11, %v2205_v20  ;;  %v642_v61 = vstv %s1755_s23  ;;  %v1573_v11 = vstv %s1840_s24 }
 0x27e   : > { %v643_v1 = vmul.f32 %v642_v61, %v2205_v20  ;;  %v1574_v8 = vmul.f32 %v1573_v11, %v2125_v4  ;;  %v529_v61 = vld [vmem:[#allocation2 + $0x1] ss:$2 sm:$0x3] }
 0x281   : > { %729 = vrot.lane.b32.xlu0 %v727_v9, %s2758_s12  ;;  %865 = vrot.lane.b32.xlu1 %v863_v12, %s1937_s14 }
 0x285   : > { %1021 = vrot.lane.b32.xlu0 %v1019_v15, %s1937_s14  ;;  %1311 = vrot.lane.b32.xlu1 %v1309_v16, %s1936_s9  ;;  %v1232_v16 = vstv %s1809_s11 }
 0x289   : > { %885 = vrot.lane.b32.xlu0 %v883_v21, %s2758_s12  ;;  %1175 = vrot.lane.b32.xlu1 %v1173_v22, %s1937_s14  ;;  %v1233_v22 = vmul.f32 %v1232_v16, %v2205_v20 }
 0x28d   : > { %1331 = vrot.lane.b32.xlu0 %v1329_v25, %s1937_s14  ;;  %1467 = vrot.lane.b32.xlu1 %v1465_v26, %s1936_s9  ;;  %s1781_s9 = sld [smem:[#allocation4 + $0x25]] }
 0x291   : > { %1041 = vrot.lane.b32.xlu0 %v1039_v29, %s2758_s12  ;;  %749 = vrot.lane.b32.xlu1 %v747_v30, %s1939_s8  ;;  %v1544_v29 = vstv %s1837_s15  ;;  %v1388_v30 = vstv %s1823_s16 }
 0x293   : > { %v2347_v33 = vpop.permute.xlu1 %550  ;;  %v2349_v34 = vpop.permute.xlu0 %854  ;;  %v922_v56 = vstv %s1781_s9  ;;  %s1943_s9 = smov 126  }
 0x294   : > { %v923_v10 = vmul.f32 %v922_v56, %v2205_v20 }
 0x295   : > { %905 = vrot.lane.b32.xlu0 %v903_v35, %s1939_s8  ;;  %1195 = vrot.lane.b32.xlu1 %v1193_v36, %s2758_s12  ;;  %v1545_v35 = vmul.f32 %v1544_v29, %v2205_v20  ;;  %v1389_v36 = vmul.f32 %v1388_v30, %v2205_v20 }
 0x297   : > { %v2355_v39 = vpop.permute.xlu1 %571  ;;  %v2357_v44 = vpop.permute.xlu0 %718 }
 0x298   : > { %v573_v43 = vrot.slane %v2355_v39, 1  ;;  %v720_v42 = vrot.slane %v2357_v44, 1 }
 0x299   : > { %1351 = vrot.lane.b32.xlu0 %v1349_v45, %s2758_s12  ;;  %1487 = vrot.lane.b32.xlu1 %v1485_v47, %s1937_s14  ;;  %s1783_s14 = sld [smem:[#allocation4 + $0x2c]] }
 0x29b   : > { %v2363_v5 = vpop.permute.xlu1 %592  ;;  %v2365_v52 = vpop.permute.xlu0 %1164 }
 0x29d   : > { %1061 = vrot.lane.b32.xlu0 %v1059_v6, %s1939_s8  ;;  %769 = vrot.lane.b32.xlu1 %v767_v54, %s1940_s26  ;;  %v621_v6 = vstv %s1753_s19  ;;  %v1408_v54 = vstv %s1825_s22 }
 0x29f   : > { %v2371_v58 = vpop.permute.xlu1 %613  ;;  %v2373_v59 = vpop.permute.xlu0 %1320  ;;  %v942_v15 = vstv %s1783_s14  ;;  %s2778_s14 = sshll.u32 %s2780_s21, 6 }
 0x2a0   : > { %v943_v21 = vmul.f32 %v942_v15, %v2205_v20  ;;  %s239_s27 = scalar_lea.vmem %s2731_s5, %s2778_s14 }
 0x2a1   : > { %925 = vrot.lane.b32.xlu0 %v923_v10, %s1940_s26  ;;  %1215 = vrot.lane.b32.xlu1 %v1213_v60, %s1939_s8  ;;  %v622_v10 = vmul.f32 %v621_v6, %v2205_v20  ;;  %v1409_v60 = vmul.f32 %v1408_v54, %v2205_v20  ;;  %v525_v54 = vld [vmem:[#allocation2] ss:$2 sm:$0x3] }
 0x2a3   : > { %v2379_v62 = vpop.permute.xlu1 %698  ;;  %v2381_v63 = vpop.permute.xlu0 %1030 }
 0x2a4   : > { %v700_v7 = vrot.slane %v2379_v62, 1 }
 0x2a5   : > { %1371 = vrot.lane.b32.xlu0 %v1369_v0, %s1939_s8  ;;  %1507 = vrot.lane.b32.xlu1 %v1505_v3, %s2758_s12  ;;  %s1839_s12 = sld [smem:[#allocation4 + $0x30]] }
 0x2a7   : > { %v2387_v9 = vpop.permute.xlu1 %1010  ;;  %v2389_v12 = vpop.permute.xlu0 %894 }
 0x2a9   : > { %1081 = vrot.lane.b32.xlu0 %v1079_v13, %s1940_s26  ;;  %789 = vrot.lane.b32.xlu1 %v787_v14, %s1941_s17 }
 0x2ab   : > { %v2395_v17 = vpop.permute.xlu1 %874  ;;  %v2397_v19 = vpop.permute.xlu0 %1340  ;;  %v1564_v37 = vstv %s1839_s12 }
 0x2ac   : > { %v1565_v50 = vmul.f32 %v1564_v37, %v2205_v20 }
 0x2ad   : > { %945 = vrot.lane.b32.xlu0 %v943_v21, %s1941_s17  ;;  %1235 = vrot.lane.b32.xlu1 %v1233_v22, %s1940_s26  ;;  %v652_v21 = vstv %s1756_s4 }
 0x2ae   : > { %v653_v20 = vmul.f32 %v652_v21, %v2125_v4 }
 0x2af   : > { %v2403_v25 = vpop.permute.xlu1 %738  ;;  %v2405_v26 = vpop.permute.xlu0 %1050 }
 0x2b1   : > { %1255 = vrot.lane.b32.xlu0 %v1253_v27, %s1941_s17  ;;  %1527 = vrot.lane.b32.xlu1 %v1525_v28, %s1939_s8  ;;  %s1754_s8 = sld [smem:[#allocation4 + $0x54]] }
 0x2b3   : > { %v2411_v31 = vpop.permute.xlu1 %1184  ;;  %v2413_v32 = vpop.permute.xlu0 %914 }
 0x2b5   : > { %1547 = vrot.lane.b32.xlu0 %v1545_v35, %s1940_s26  ;;  %1391 = vrot.lane.b32.xlu1 %v1389_v36, %s1940_s26 }
 0x2b7   : > { %v2419_v45 = vpop.permute.xlu1 %1476  ;;  %v2421_v47 = vpop.permute.xlu0 %1360  ;;  %v631_v13 = vstv %s1754_s8 }
 0x2b8   : > { %v632_v16 = vmul.f32 %v631_v13, %v2125_v4  ;;  %v856_v13 = vrot.slane %v2349_v34, 1 }
 0x2b9   : > { %1567 = vrot.lane.b32.xlu0 %v1565_v50, %s1941_s17  ;;  %1101 = vrot.lane.b32.xlu1 %v1099_v2, %s1941_s17 }
 0x2bb   : > { %v2427_v56 = vpop.permute.xlu1 %758  ;;  %v2429_v57 = vpop.permute.xlu0 %1070 }
 0x2bd   : > { %624 = vrot.lane.b32.xlu0 %v622_v10, %s1940_s26  ;;  %1411 = vrot.lane.b32.xlu1 %v1409_v60, %s1941_s17 }
 0x2bf   : > { %v2435_v0 = vpop.permute.xlu1 %1204  ;;  %v2437_v3 = vpop.permute.xlu0 %934 }
 0x2c1   : > { %645 = vrot.lane.b32.xlu0 %v643_v1, %s1941_s17  ;;  %1576 = vrot.lane.b32.xlu1 %v1574_v8, %s1941_s17  ;;  %v552_v8 = vrot.slane %v2347_v33, 1 }
 0x2c3   : > { %v2443_v14 = vpop.permute.xlu1 %1496  ;;  %v2445_v15 = vpop.permute.xlu0 %1380 }
 0x2c5   : > { %634 = vrot.lane.b32.xlu1 %v632_v16, %s1940_s26  ;;  %s523_s26 = sld [smem:[#allocation4]] }
 0x2c7   : > { %v2449_v22 = vpop.permute.xlu1 %778  ;;  %v2451_v23 = vpop.permute.xlu0 %1090 }
 0x2c9   : > { %655 = vrot.lane.b32.xlu1 %v653_v20, %s1941_s17  ;;  %s1744_s17 = sld [smem:[#allocation4 + $0x31]] }
 0x2cb   : > { %v2455_v24 = vpop.permute.xlu1 %1224  ;;  %v2457_v27 = vpop.permute.xlu0 %1244  ;;  %v526_v6 = vstv %s523_s26 }
 0x2cc   : > { %v527_v1 = vmul.f32 %v526_v6, %v525_v54  ;;  %v553_v6 = vsel %vm542_vm10, %v2347_v33, %v552_v8  ;;  %v701_v33 = vsel %vm542_vm10, %v2379_v62, %v700_v7  ;;  %v1012_v62 = vrot.slane %v2387_v9, 1 }
 0x2cf   : > { %v2459_v28 = vpop.permute.xlu1 %1516  ;;  %v2461_v29 = vpop.permute.xlu0 %1536  ;;  %v530_v11 = vstv %s1744_s17 }
 0x2d0   : > { %2759 = vst [vmem:[#allocation11_spill] sm:$0xff] %v2461_v29  ;;  %v531_v16 = vmul.f32 %v530_v11, %v529_v61  ;;  %v857_v11 = vsel %vm542_vm10, %v2349_v34, %v856_v13  ;;  %v721_v34 = vsel %vm564_vm11, %v2357_v44, %v720_v42  ;;  %v615_v44 = vrot.slane %v2371_v58, 1 }
 0x2d3   : > { %v2463_v30 = vpop.permute.xlu1 %798  ;;  %v2465_v35 = vpop.permute.xlu0 %1264 }
 0x2d4   : > { %2760 = vst [vmem:[#allocation12_spill] sm:$0xff] %v2465_v35 }
 0x2d7   : > { %v2467_v36 = vpop.permute.xlu1 %954  ;;  %v2469_v37 = vpop.permute.xlu0 %1556 }
 0x2d8   : > { %2761 = vst [vmem:[#allocation13_spill] sm:$0xff] %v2467_v36  ;;  %2762 = vst [vmem:[#allocation14_spill] sm:$0xff] %v2469_v37 }
 0x2db   : > { %v2471_v4 = vpop.permute.xlu1 %1400  ;;  %v562_v38 = vpop.permute.xlu0 %561 }
 0x2dc   : > { %2763 = vst [vmem:[#allocation15_spill] sm:$0xff] %v2471_v4  ;;  %v563_v54 = vrot.slane %v562_v38, 1  ;;  %v594_v4 = vrot.slane %v2363_v5, 1 }
 0x2de   : > { %v595_v7 = vsel %vm585_vm12, %v2363_v5, %v594_v4 }
 0x2df   : > { %v2473_v50 = vpop.permute.xlu1 %1110  ;;  %v583_v2 = vpop.permute.xlu0 %582 }
 0x2e0   : > { %2764 = vst [vmem:[#allocation16_spill] sm:$0xff] %v2473_v50 }
 0x2e3   : > { %v2475_v10 = vpop.permute.xlu1 %1420  ;;  %v2477_v60 = vpop.permute.xlu0 %603 }
 0x2e4   : > { %2765 = vst [vmem:[#allocation17_spill] sm:$0xff] %v2475_v10  ;;  %v532_v10 = vadd.f32 %v531_v16, %v527_v1  ;;  %v1166_v1 = vrot.slane %v2365_v52, 1  ;;  %v605_v4 = vrot.slane %v2477_v60, 1 }
 0x2e6   : > { %v1167_v42 = vsel %vm542_vm10, %v2365_v52, %v1166_v1  ;;  %v1013_v52 = vsel %vm542_vm10, %v2387_v9, %v1012_v62  ;;  %v616_v9 = vsel %vm606_vm13, %v2371_v58, %v615_v44 }
 0x2e7   : > { %v540_v21 = vpop.permute.xlu1 %539  ;;  %v690_v20 = vpop.permute.xlu0 %689 }
 0x2e8   : > { %v541_v48 = vrot.slane %v540_v21, 1  ;;  %v691_v49 = vrot.slane %v690_v20, 1 }
 0x2ea   : > { %v543_v50 = vsel %vm542_vm10, %v540_v21, %v541_v48  ;;  %v692_v61 = vsel %vm542_vm10, %v690_v20, %v691_v49  ;;  %v574_v49 = vsel %vm564_vm11, %v2355_v39, %v573_v43 }
 0x2eb   : > { %v545_v37 = vadd.f32 %v543_v50, %v532_v10  ;;  %v694_v35 = vadd.f32 %v692_v61, %v2236_v40  ;;  %v710_v29 = vpop.permute.xlu1 %709  ;;  %v846_v36 = vpop.permute.xlu0 %845  ;;  %v565_v50 = vsel %vm564_vm11, %v562_v38, %v563_v54  ;;  %v584_v40 = vrot.slane %v583_v2, 1 }
 0x2ec   : > { %v711_v8 = vrot.slane %v710_v29, 1  ;;  %v847_v48 = vrot.slane %v846_v36, 1 }
 0x2ed   : > { %v555_v13 = vadd.f32 %v553_v6, %v545_v37  ;;  %v703_v16 = vadd.f32 %v701_v33, %v694_v35  ;;  %v586_v5 = vsel %vm585_vm12, %v583_v2, %v584_v40  ;;  %v740_v2 = vrot.slane %v2403_v25, 1 }
 0x2ee   : > { %v712_v10 = vsel %vm564_vm11, %v710_v29, %v711_v8  ;;  %v848_v21 = vsel %vm542_vm10, %v846_v36, %v847_v48  ;;  %v1322_v29 = vrot.slane %v2373_v59, 1 }
 0x2ef   : > { %v567_v20 = vadd.f32 %v565_v50, %v555_v13  ;;  %v714_v61 = vadd.f32 %v712_v10, %v703_v16  ;;  %v1002_v43 = vpop.permute.xlu1 %1001  ;;  %v1156_v39 = vpop.permute.xlu0 %1155  ;;  %v850_v36 = vadd.f32 %v848_v21, %v2238_v41  ;;  %v876_v41 = vrot.slane %v2395_v17, 1 }
 0x2f0   : > { %v1003_v35 = vrot.slane %v1002_v43, 1  ;;  %v1157_v37 = vrot.slane %v1156_v39, 1  ;;  %v741_v58 = vsel %vm585_vm12, %v2403_v25, %v740_v2 }
 0x2f1   : > { %v576_v38 = vadd.f32 %v574_v49, %v567_v20  ;;  %v723_v6 = vadd.f32 %v721_v34, %v714_v61  ;;  %v859_v50 = vadd.f32 %v857_v11, %v850_v36  ;;  %v1032_v20 = vrot.slane %v2381_v63, 1 }
 0x2f2   : > { %v1004_v54 = vsel %vm542_vm10, %v1002_v43, %v1003_v35  ;;  %v1158_v33 = vsel %vm542_vm10, %v1156_v39, %v1157_v37 }
 0x2f3   : > { %v1006_v1 = vadd.f32 %v1004_v54, %v2244_v46  ;;  %v1160_v8 = vadd.f32 %v1158_v33, %v2248_v51  ;;  %v866_v48 = vpop.permute.xlu1 %865  ;;  %v730_v49 = vpop.permute.xlu0 %729  ;;  %v588_v13 = vadd.f32 %v586_v5, %v576_v38  ;;  %v607_v46 = vsel %vm606_vm13, %v2477_v60, %v605_v4 }
 0x2f4   : > { %v867_v34 = vrot.slane %v866_v48, 1  ;;  %v731_v16 = vrot.slane %v730_v49, 1  ;;  %v896_v4 = vrot.slane %v2389_v12, 1 }
 0x2f5   : > { %v1015_v40 = vadd.f32 %v1013_v52, %v1006_v1  ;;  %v1169_v10 = vadd.f32 %v1167_v42, %v1160_v8  ;;  %v597_v21 = vadd.f32 %v595_v7, %v588_v13  ;;  %v877_v7 = vsel %vm564_vm11, %v2395_v17, %v876_v41 }
 0x2f6   : > { %v868_v51 = vsel %vm564_vm11, %v866_v48, %v867_v34  ;;  %v732_v62 = vsel %vm585_vm12, %v730_v49, %v731_v16  ;;  %v1033_v52 = vsel %vm564_vm11, %v2381_v63, %v1032_v20  ;;  %v1186_v1 = vrot.slane %v2411_v31, 1 }
 0x2f7   : > { %v870_v61 = vadd.f32 %v868_v51, %v859_v50  ;;  %v734_v43 = vadd.f32 %v732_v62, %v723_v6  ;;  %v1312_v39 = vpop.permute.xlu1 %1311  ;;  %v1022_v35 = vpop.permute.xlu0 %1021  ;;  %v609_v11 = vadd.f32 %v607_v46, %v597_v21  ;;  %v1323_v6 = vsel %vm542_vm10, %v2373_v59, %v1322_v29 }
 0x2f8   : > { %v1313_v42 = vrot.slane %v1312_v39, 1  ;;  %v1023_v44 = vrot.slane %v1022_v35, 1  ;;  %v897_v29 = vsel %vm585_vm12, %v2389_v12, %v896_v4  ;;  %v1187_v63 = vsel %vm564_vm11, %v2411_v31, %v1186_v1 }
 0x2f9   : > { %v879_v60 = vadd.f32 %v877_v7, %v870_v61  ;;  %v743_v37 = vadd.f32 %v741_v58, %v734_v43  ;;  %v2531_v38 = vadd.f32 %v616_v9, %v609_v11  ;;  %v760_v11 = vrot.slane %v2427_v56, 1 }
 0x2fa   : > { %v1314_v36 = vsel %vm542_vm10, %v1312_v39, %v1313_v42  ;;  %v1024_v5 = vsel %vm564_vm11, %v1022_v35, %v1023_v44 }
 0x2fb   : > { %v1316_v17 = vadd.f32 %v1314_v36, %v2253_v53  ;;  %v1026_v54 = vadd.f32 %v1024_v5, %v1015_v40  ;;  %v1176_v33 = vpop.permute.xlu1 %1175  ;;  %v886_v25 = vpop.permute.xlu0 %885  ;;  %v1342_v53 = vrot.slane %v2397_v19, 1  ;;  %v1478_v40 = vrot.slane %v2419_v45, 1 }
 0x2fc   : > { %v1177_v8 = vrot.slane %v1176_v33, 1  ;;  %v887_v48 = vrot.slane %v886_v25, 1 }
 0x2fd   : > { %v1325_v49 = vadd.f32 %v1323_v6, %v1316_v17  ;;  %v1035_v13 = vadd.f32 %v1033_v52, %v1026_v54  ;;  %v1343_v12 = vsel %vm564_vm11, %v2397_v19, %v1342_v53  ;;  %v1479_v35 = vsel %vm542_vm10, %v2419_v45, %v1478_v40 }
 0x2fe   : > { %v1178_v41 = vsel %vm564_vm11, %v1176_v33, %v1177_v8  ;;  %v888_v59 = vsel %vm585_vm12, %v886_v25, %v887_v48  ;;  %v761_v45 = vsel %vm606_vm13, %v2427_v56, %v760_v11  ;;  %v1206_v54 = vrot.slane %v2435_v0, 1 }
 0x2ff   : > { %v1180_v2 = vadd.f32 %v1178_v41, %v1169_v10  ;;  %v890_v34 = vadd.f32 %v888_v59, %v879_v60  ;;  %v1468_v16 = vpop.permute.xlu1 %1467  ;;  %v1332_v50 = vpop.permute.xlu0 %1331  ;;  %v1052_v10 = vrot.slane %v2405_v26, 1  ;;  %v1072_v40 = vrot.slane %v2429_v57, 1 }
 0x300   : > { %v1469_v21 = vrot.slane %v1468_v16, 1  ;;  %v1333_v9 = vrot.slane %v1332_v50, 1  ;;  %v1207_v56 = vsel %vm585_vm12, %v2435_v0, %v1206_v54 }
 0x301   : > { %v1189_v46 = vadd.f32 %v1187_v63, %v1180_v2  ;;  %v899_v51 = vadd.f32 %v897_v29, %v890_v34  ;;  %v1053_v36 = vsel %vm585_vm12, %v2405_v26, %v1052_v10  ;;  %v1498_v29 = vrot.slane %v2443_v14, 1 }
 0x302   : > { %v1470_v62 = vsel %vm542_vm10, %v1468_v16, %v1469_v21  ;;  %v1334_v20 = vsel %vm564_vm11, %v1332_v50, %v1333_v9 }
 0x303   : > { %v1472_v61 = vadd.f32 %v1470_v62, %v2257_v55  ;;  %v1336_v43 = vadd.f32 %v1334_v20, %v1325_v49  ;;  %v750_v39 = vpop.permute.xlu1 %749  ;;  %v1042_v31 = vpop.permute.xlu0 %1041  ;;  %v916_v55 = vrot.slane %v2413_v32, 1  ;;  %v1499_v0 = vsel %vm564_vm11, %v2443_v14, %v1498_v29 }
 0x304   : > { %v751_v7 = vrot.slane %v750_v39, 1  ;;  %v1043_v58 = vrot.slane %v1042_v31, 1  ;;  %v780_v62 = vrot.slane %v2449_v22, 1 }
 0x305   : > { %v1481_v42 = vadd.f32 %v1479_v35, %v1472_v61  ;;  %v1345_v44 = vadd.f32 %v1343_v12, %v1336_v43  ;;  %v917_v26 = vsel %vm606_vm13, %v2413_v32, %v916_v55 }
 0x306   : > { %v752_v60 = vsel %vm606_vm13, %v750_v39, %v751_v7  ;;  %v1044_v19 = vsel %vm585_vm12, %v1042_v31, %v1043_v58  ;;  %v1073_v39 = vsel %vm606_vm13, %v2429_v57, %v1072_v40  ;;  %v936_v31 = vrot.slane %v2437_v3, 1 }
 0x307   : > { %v754_v5 = vadd.f32 %v752_v60, %v743_v37  ;;  %v1046_v6 = vadd.f32 %v1044_v19, %v1035_v13  ;;  %v1196_v4 = vpop.permute.xlu1 %1195  ;;  %v906_v17 = vpop.permute.xlu0 %905  ;;  %v1362_v37 = vrot.slane %v2421_v47, 1  ;;  %v781_v58 = vsel %vm627_vm14, %v2449_v22, %v780_v62 }
 0x308   : > { %v1197_v33 = vrot.slane %v1196_v4, 1  ;;  %v907_v25 = vrot.slane %v906_v17, 1  ;;  %v937_v57 = vsel %vm627_vm14, %v2437_v3, %v936_v31 }
 0x309   : > { %v763_v52 = vadd.f32 %v761_v45, %v754_v5  ;;  %v1055_v1 = vadd.f32 %v1053_v36, %v1046_v6  ;;  %v1363_v32 = vsel %vm585_vm12, %v2421_v47, %v1362_v37  ;;  %v1382_v6 = vrot.slane %v2445_v15, 1 }
 0x30a   : > { %v1198_v8 = vsel %vm585_vm12, %v1196_v4, %v1197_v33  ;;  %v908_v48 = vsel %vm606_vm13, %v906_v17, %v907_v25  ;;  %v1518_v33 = vrot.slane %v2459_v28, 1  ;;  %v1092_v37 = vrot.slane %v2451_v23, 1 }
 0x30b   : > { %v1200_v49 = vadd.f32 %v1198_v8, %v1189_v46  ;;  %v910_v13 = vadd.f32 %v908_v48, %v899_v51  ;;  %v1488_v41 = vpop.permute.xlu1 %1487  ;;  %v1352_v59 = vpop.permute.xlu0 %1351  ;;  %v1383_v3 = vsel %vm606_vm13, %v2445_v15, %v1382_v6  ;;  %v2611_v15 = vsub.s32 1, %v2114_v18 }
 0x30c   : > { %v1489_v53 = vrot.slane %v1488_v41, 1  ;;  %v1353_v2 = vrot.slane %v1352_v59, 1 }
 0x30d   : > { %v1209_v34 = vadd.f32 %v1207_v56, %v1200_v49  ;;  %v919_v16 = vadd.f32 %v917_v26, %v910_v13  ;;  %v800_v56 = vrot.slane %v2463_v30, 1 }
 0x30e   : > { %v1490_v50 = vsel %vm564_vm11, %v1488_v41, %v1489_v53  ;;  %v1354_v63 = vsel %vm585_vm12, %v1352_v59, %v1353_v2 }
 0x30f   : > { %v1492_v21 = vadd.f32 %v1490_v50, %v1481_v42  ;;  %v1356_v9 = vadd.f32 %v1354_v63, %v1345_v44  ;;  %v770_v46 = vpop.permute.xlu1 %769  ;;  %v1062_v51 = vpop.permute.xlu0 %1061  ;;  %v1226_v42 = vrot.slane %v2455_v24, 1 }
 0x310   : > { %v771_v20 = vrot.slane %v770_v46, 1  ;;  %v1063_v12 = vrot.slane %v1062_v51, 1 }
 0x311   : > { %v1501_v10 = vadd.f32 %v1499_v0, %v1492_v21  ;;  %v1365_v61 = vadd.f32 %v1363_v32, %v1356_v9  ;;  %v1227_v22 = vsel %vm606_vm13, %v2455_v24, %v1226_v42  ;;  %v1519_v24 = vsel %vm585_vm12, %v2459_v28, %v1518_v33  ;;  %v2766_v0 = vld [vmem:[#allocation13_spill] sm:$0xff] }
 0x312   : > { %v772_v43 = vsel %vm627_vm14, %v770_v46, %v771_v20  ;;  %v1064_v47 = vsel %vm606_vm13, %v1062_v51, %v1063_v12  ;;  %v1093_v28 = vsel %vm627_vm14, %v2451_v23, %v1092_v37  ;;  %v1246_v32 = vrot.slane %v2457_v27, 1 }
 0x313   : > { %v774_v35 = vadd.f32 %v772_v43, %v763_v52  ;;  %v1066_v11 = vadd.f32 %v1064_v47, %v1055_v1  ;;  %v1216_v7 = vpop.permute.xlu1 %1215  ;;  %v926_v14 = vpop.permute.xlu0 %925  ;;  %v801_v51 = vsel %vm648_vm15, %v2463_v30, %v800_v56  ;;  %v956_v62 = vrot.slane %v2766_v0, 1  ;;  %v2767_v47 = vld [vmem:[#allocation11_spill] sm:$0xff] }
 0x314   : > { %v1217_v44 = vrot.slane %v1216_v7, 1  ;;  %v927_v60 = vrot.slane %v926_v14, 1  ;;  %v1538_v23 = vrot.slane %v2767_v47, 1 }
 0x315   : > { %v783_v19 = vadd.f32 %v781_v58, %v774_v35  ;;  %v1075_v36 = vadd.f32 %v1073_v39, %v1066_v11  ;;  %v2768_v39 = vld [vmem:[#allocation12_spill] sm:$0xff] }
 0x316   : > { %v1218_v55 = vsel %vm606_vm13, %v1216_v7, %v1217_v44  ;;  %v928_v5 = vsel %vm627_vm14, %v926_v14, %v927_v60  ;;  %v1266_v31 = vrot.slane %v2768_v39, 1  ;;  %v957_v60 = vsel %vm648_vm15, %v2766_v0, %v956_v62 }
 0x317   : > { %v1220_v4 = vadd.f32 %v1218_v55, %v1209_v34  ;;  %v930_v17 = vadd.f32 %v928_v5, %v919_v16  ;;  %v1508_v45 = vpop.permute.xlu1 %1507  ;;  %v1372_v54 = vpop.permute.xlu0 %1371  ;;  %v2608_v16 = vsub.s32 0, %v2114_v18 }
 0x318   : > { %v1509_v25 = vrot.slane %v1508_v45, 1  ;;  %v1373_v52 = vrot.slane %v1372_v54, 1  ;;  %v1267_v6 = vsel %vm648_vm15, %v2768_v39, %v1266_v31 }
 0x319   : > { %v1229_v1 = vadd.f32 %v1227_v22, %v1220_v4  ;;  %v939_v8 = vadd.f32 %v937_v57, %v930_v17  ;;  %v1539_v57 = vsel %vm606_vm13, %v2767_v47, %v1538_v23 }
 0x31a   : > { %v1510_v48 = vsel %vm585_vm12, %v1508_v45, %v1509_v25  ;;  %v1374_v26 = vsel %vm606_vm13, %v1372_v54, %v1373_v52  ;;  %v2769_v52 = vld [vmem:[#allocation14_spill] sm:$0xff] }
 0x31b   : > { %v1512_v49 = vadd.f32 %v1510_v48, %v1501_v10  ;;  %v1376_v13 = vadd.f32 %v1374_v26, %v1365_v61  ;;  %v790_v41 = vpop.permute.xlu1 %789  ;;  %v1082_v59 = vpop.permute.xlu0 %1081  ;;  %v2622_v61 = vsub.s32 2, %v2114_v18  ;;  %v1247_v18 = vsel %vm627_vm14, %v2457_v27, %v1246_v32 }
 0x31c   : > { %v791_v29 = vrot.slane %v790_v41, 1  ;;  %v1083_v53 = vrot.slane %v1082_v59, 1 }
 0x31d   : > { %v1521_v2 = vadd.f32 %v1519_v24, %v1512_v49  ;;  %v1385_v34 = vadd.f32 %v1383_v3, %v1376_v13 }
 0x31e   : > { %v792_v50 = vsel %vm648_vm15, %v790_v41, %v791_v29  ;;  %v1084_v63 = vsel %vm627_vm14, %v1082_v59, %v1083_v53 }
 0x31f   : > { %v794_v40 = vadd.f32 %v792_v50, %v783_v19  ;;  %v1086_v21 = vadd.f32 %v1084_v63, %v1075_v36  ;;  %v1236_v9 = vpop.permute.xlu1 %1235  ;;  %v946_v46 = vpop.permute.xlu0 %945 }
 0x320   : > { %v1237_v20 = vrot.slane %v1236_v9, 1  ;;  %v947_v12 = vrot.slane %v946_v46, 1 }
 0x321   : > { %v803_v10 = vadd.f32 %v801_v51, %v794_v40  ;;  %v1095_v43 = vadd.f32 %v1093_v28, %v1086_v21  ;;  %v2771_v28 = vld [vmem:[#allocation16_spill] sm:$0xff] }
 0x322   : > { %v1238_v35 = vsel %vm627_vm14, %v1236_v9, %v1237_v20  ;;  %v948_v11 = vsel %vm648_vm15, %v946_v46, %v947_v12  ;;  %v1112_v32 = vrot.slane %v2771_v28, 1  ;;  %v2772_v20 = vld [vmem:[#allocation17_spill] sm:$0xff] }
 0x323   : > { %v1240_v7 = vadd.f32 %v1238_v35, %v1229_v1  ;;  %v950_v14 = vadd.f32 %v948_v11, %v939_v8  ;;  %v1528_v30 = vpop.permute.xlu1 %1527  ;;  %v1256_v58 = vpop.permute.xlu0 %1255  ;;  %v812_v42 = vrot.slane %v803_v10, %v2611_v15  ;;  %v808_v44 = vrot.slane %v803_v10, %v2608_v16  ;;  %v2770_v8 = vld [vmem:[#allocation15_spill] sm:$0xff] }
 0x324   : > { %v1529_v19 = vrot.slane %v1528_v30, 1  ;;  %v1257_v36 = vrot.slane %v1256_v58, 1  ;;  %v816_v33 = vrot.slane %v803_v10, %v2622_v61  ;;  %v1558_v1 = vrot.slane %v2769_v52, 1 }
 0x325   : > { %v959_v55 = vadd.f32 %v957_v60, %v950_v14  ;;  %v1249_v5 = vadd.f32 %v1247_v18, %v1240_v7  ;;  %819 = vrot.lane.b32.xlu1 %v812_v42, %s1942_s25  ;;  %817 = vrot.lane.b32.xlu0 %v808_v44, %s1942_s25  ;;  %v1402_v48 = vrot.slane %v2770_v8, 1  ;;  %v1113_v62 = vsel %vm648_vm15, %v2771_v28, %v1112_v32 }
 0x326   : > { %v1530_v4 = vsel %vm606_vm13, %v1528_v30, %v1529_v19  ;;  %v1258_v27 = vsel %vm648_vm15, %v1256_v58, %v1257_v36  ;;  %v1559_v50 = vsel %vm627_vm14, %v2769_v52, %v1558_v1  ;;  %v1422_v12 = vrot.slane %v2772_v20, 1 }
 0x327   : > { %v1532_v17 = vadd.f32 %v1530_v4, %v1521_v2  ;;  %v1260_v45 = vadd.f32 %v1258_v27, %v1249_v5  ;;  %v1392_v54 = vpop.permute.xlu1 %1391  ;;  %v1548_v22 = vpop.permute.xlu0 %1547  ;;  %v964_v25 = vrot.slane %v959_v55, %v2608_v16  ;;  %v968_v53 = vrot.slane %v959_v55, %v2611_v15 }
 0x328   : > { %v1393_v26 = vrot.slane %v1392_v54, 1  ;;  %v1549_v3 = vrot.slane %v1548_v22, 1  ;;  %v972_v2 = vrot.slane %v959_v55, %v2622_v61  ;;  %v1403_v63 = vsel %vm627_vm14, %v2770_v8, %v1402_v48 }
 0x329   : > { %v2644_v37 = vadd.f32 %v1267_v6, %v1260_v45  ;;  %v1541_v49 = vadd.f32 %v1539_v57, %v1532_v17  ;;  %821 = vrot.lane.b32.xlu0 %v816_v33, %s1942_s25  ;;  %973 = vrot.lane.b32.xlu1 %v964_v25, %s1943_s9  ;;  %vm1445_vm13 = vcmask 1006592  }
 0x32a   : > { %v1394_v13 = vsel %vm627_vm14, %v1392_v54, %v1393_v26  ;;  %v1550_v41 = vsel %vm627_vm14, %v1548_v22, %v1549_v3 }
 0x32b   : > { %v1396_v59 = vadd.f32 %v1394_v13, %v1385_v34  ;;  %v1552_v24 = vadd.f32 %v1550_v41, %v1541_v49  ;;  %v1102_v56 = vpop.permute.xlu1 %1101  ;;  %v1568_v29 = vpop.permute.xlu0 %1567  ;;  %v1274_v60 = vrot.slane %v2644_v37, %v2608_v16  ;;  %v1278_v17 = vrot.slane %v2644_v37, %v2611_v15 }
 0x32c   : > { %v1103_v40 = vrot.slane %v1102_v56, 1  ;;  %v1569_v58 = vrot.slane %v1568_v29, 1  ;;  %v1282_v45 = vrot.slane %v2644_v37, %v2622_v61 }
 0x32d   : > { %v1561_v21 = vadd.f32 %v1559_v50, %v1552_v24  ;;  %975 = vrot.lane.b32.xlu0 %v968_v53, %s1943_s9  ;;  %977 = vrot.lane.b32.xlu1 %v972_v2, %s1943_s9  ;;  %v1405_v34 = vadd.f32 %v1403_v63, %v1396_v59 }
 0x32e   : > { %v1104_v9 = vsel %vm648_vm15, %v1102_v56, %v1103_v40  ;;  %v1570_v57 = vsel %vm648_vm15, %v1568_v29, %v1569_v58  ;;  %v2773_v56 = vlaneseq }
 0x32f   : > { %v1106_v46 = vadd.f32 %v1104_v9, %v1095_v43  ;;  %v1412_v51 = vpop.permute.xlu1 %1411  ;;  %v625_v0 = vpop.permute.xlu0 %624  ;;  %v1423_v43 = vsel %vm648_vm15, %v2772_v20, %v1422_v12  ;;  %v1572_v33 = vadd.f32 %v1570_v57, %v1561_v21 }
 0x330   : > { %v1413_v10 = vrot.slane %v1412_v51, 1  ;;  %v626_v39 = vrot.slane %v625_v0, 1  ;;  %v469_v29 = vand.u32 127, %v2773_v56 }
 0x331   : > { %v1115_v47 = vadd.f32 %v1113_v62, %v1106_v46 }
 0x332   : > { %v1414_v23 = vsel %vm648_vm15, %v1412_v51, %v1413_v10  ;;  %v628_v42 = vsel %vm627_vm14, %v625_v0, %v626_v39  ;;  %v470_v50 = vadd.s32 128, %v469_v29  ;;  %v471_v32 = vand.u32 15, %v469_v29 }
 0x333   : > { %v1416_v31 = vadd.f32 %v1414_v23, %v1405_v34  ;;  %v1577_v35 = vpop.permute.xlu1 %1576  ;;  %v1120_v11 = vrot.slane %v1115_v47, %v2608_v16  ;;  %v1124_v7 = vrot.slane %v1115_v47, %v2611_v15  ;;  %v646_v30 = vpop.permute.xlu0 %645  ;;  %v1128_v18 = vrot.slane %v1115_v47, %v2622_v61 }
 0x334   : > { %v1578_v19 = vrot.slane %v1577_v35, 1  ;;  %v647_v36 = vrot.slane %v646_v30, 1  ;;  %v630_v5 = vadd.f32 %v628_v42, %v2531_v38  ;;  %v472_v40 = vand.u32 15, %v470_v50 }
 0x335   : > { %v1425_v14 = vadd.f32 %v1423_v43, %v1416_v31  ;;  %1129 = vrot.lane.b32.xlu0 %v1120_v11, %s1944_s28  ;;  %1131 = vrot.lane.b32.xlu1 %v1124_v7, %s1944_s28  ;;  %v473_v34 = vadd.s32 4294967293, %v471_v32  ;;  %v481_v9 = vadd.s32 4294967294, %v471_v32  ;;  %v489_v0 = vadd.s32 4294967295, %v471_v32 }
 0x336   : > { %v1579_v54 = vsel %vm648_vm15, %v1577_v35, %v1578_v19  ;;  %v649_v22 = vsel %vm648_vm15, %v646_v30, %v647_v36  ;;  %v482_v46 = vadd.s32 4294967294, %v472_v40  ;;  %v490_v12 = vadd.s32 4294967295, %v472_v40 }
 0x337   : > { %v635_v44 = vpop.permute.xlu1 %634  ;;  %v1581_v1 = vadd.f32 %v1579_v54, %v1572_v33  ;;  %v1430_v48 = vrot.slane %v1425_v14, %v2608_v16  ;;  %v1434_v26 = vrot.slane %v1425_v14, %v2611_v15  ;;  %v1438_v49 = vrot.slane %v1425_v14, %v2622_v61 }
 0x338   : > { %v636_v55 = vrot.slane %v635_v44, 1  ;;  %vm475_vm1 = vcmp.ge.s32.totalorder %v473_v34, 0  ;;  %vm483_vm3 = vcmp.ge.s32.totalorder %v481_v9, 0  ;;  %v522_v10 = vstv %s2686_s10 }
 0x339   : > { %1133 = vrot.lane.b32.xlu0 %v1128_v18, %s1944_s28  ;;  %1283 = vrot.lane.b32.xlu1 %v1274_v60, %s1945_s29  ;;  %v1586_v37 = vrot.slane %v1581_v1, %v2608_v16  ;;  %v1590_v13 = vrot.slane %v1581_v1, %v2611_v15  ;;  %v1594_v41 = vrot.slane %v1581_v1, %v2622_v61  ;;  %v474_v61 = vadd.s32 4294967293, %v472_v40 }
 0x33a   : > { %v637_v6 = vsel %vm627_vm14, %v635_v44, %v636_v55  ;;  %vm484_vm4 = vcmp.ge.s32.totalorder %v482_v46, 0  ;;  %v497_v39 = vadd.s32 1, %v471_v32  ;;  %v498_v31 = vadd.s32 1, %v472_v40 }
 0x33b   : > { %v639_v4 = vadd.f32 %v637_v6, %v630_v5  ;;  %v656_v27 = vpop.permute.xlu1 %655  ;;  %vm476_vm2 = vcmp.ge.s32.totalorder %v474_v61, 0  ;;  %vm491_vm6 = vcmp.ge.s32.totalorder %v489_v0, 0  ;;  %v505_v14 = vadd.s32 2, %v471_v32  ;;  %v1624_v0 = vld [vmem:[%s2011_s30 + $0x10] sm:$0xff] }
 0x33c   : > { %v657_v38 = vrot.slane %v656_v27, 1  ;;  %vm492_vm7 = vcmp.ge.s32.totalorder %v490_v12, 0  ;;  %v506_v18 = vadd.s32 2, %v472_v40  ;;  %vm501_vm10 = vcmp.lt.s32.totalorder %v497_v39, 16  ;;  %v1626_v12 = vld [vmem:[%s2011_s30 + $0x20] sm:$0xff]  ;;  %v1629_v39 = vld [vmem:[%s2011_s30 + $0x38] sm:$0xff] }
 0x33d   : > { %v651_v25 = vadd.f32 %v649_v22, %v639_v4  ;;  %1285 = vrot.lane.b32.xlu0 %v1278_v17, %s1945_s29  ;;  %1287 = vrot.lane.b32.xlu1 %v1282_v45, %s1945_s29  ;;  %vm502_vm11 = vcmp.lt.s32.totalorder %v498_v31, 16  ;;  %vm509_vm12 = vcmp.lt.s32.totalorder %v505_v14, 16  ;;  %v513_v22 = vadd.s32 3, %v471_v32  ;;  %v2775_v14 = vld [vmem:[#allocation8_spill] sm:$0xff] }
 0x33e   : > { %v658_v52 = vsel %vm648_vm15, %v656_v27, %v657_v38  ;;  %vm510_vm14 = vcmp.lt.s32.totalorder %v506_v18, 16  ;;  %vm1601_vm15 = vcmask 998400  }
 0x33f   : > { %v660_v8 = vadd.f32 %v658_v52, %v651_v25  ;;  %v514_v52 = vadd.s32 3, %v472_v40 }
 0x341   : > { %v669_v3 = vrot.slane %v660_v8, %v2611_v15  ;;  %1439 = vrot.lane.b32.xlu0 %v1430_v48, %s1946_s6  ;;  %1441 = vrot.lane.b32.xlu1 %v1434_v26, %s1946_s6  ;;  %v665_v51 = vrot.slane %v660_v8, %v2608_v16 }
 0x343   : > { %v672_v35 = vsel %vm475_vm1, %v665_v51, 0.0  ;;  %v673_v11 = vsel %vm476_vm2, %v669_v3, 0.0  ;;  %vm518_vm1 = vcmp.lt.s32.totalorder %v514_v52, 16 }
 0x344   : > { %v674_v60 = vadd.f32 %v672_v35, %v522_v10  ;;  %v675_v19 = vadd.f32 %v673_v11, %v522_v10  ;;  %v1628_v10 = vld [vmem:[%s2011_s30 + $0x30] sm:$0xff]  ;;  %v2774_v35 = vld [vmem:[#allocation7_spill] sm:$0xff] }
 0x345   : > { %1443 = vrot.lane.b32.xlu0 %v1438_v49, %s1946_s6  ;;  %1595 = vrot.lane.b32.xlu1 %v1586_v37, %s1947_s7  ;;  %v1632_v11 = vmul.f32 %v2774_v35, %v1624_v0 }
 0x349   : > { %1597 = vrot.lane.b32.xlu0 %v1590_v13, %s1947_s7  ;;  %1599 = vrot.lane.b32.xlu1 %v1594_v41, %s1947_s7 }
 0x397   : > { %v820_v59 = vpop.permute.xlu1 %819  ;;  %v818_v24 = vpop.permute.xlu0 %817 }
 0x398   : > { %v824_v47 = vsel %vm823_vm0, %v818_v24, %v820_v59 }
 0x399   : > { %v828_v42 = vsel %vm483_vm3, %v824_v47, 0.0  ;;  %v1623_v47 = vld [vmem:[%s2011_s30 + $0x8] sm:$0xff] }
 0x39a   : > { %v830_v6 = vadd.f32 %v828_v42, %v674_v60 }
 0x39b   : > { %v974_v53 = vpop.permute.xlu1 %973  ;;  %v822_v2 = vpop.permute.xlu0 %821 }
 0x39c   : > { %v825_v23 = vsel %vm823_vm0, %v820_v59, %v822_v2  ;;  %vm517_vm0 = vcmp.lt.s32.totalorder %v513_v22, 16 }
 0x39d   : > { %v829_v44 = vsel %vm484_vm4, %v825_v23, 0.0  ;;  %v1627_v23 = vld [vmem:[%s2011_s30 + $0x28] sm:$0xff] }
 0x39e   : > { %v831_v4 = vadd.f32 %v829_v44, %v675_v19  ;;  %v2777_v44 = vld [vmem:[#allocation9_spill] sm:$0xff]  ;;  %v1631_v19 = vmul.f32 %v2775_v14, %v1623_v47 }
 0x39f   : > { %v978_v63 = vpop.permute.xlu1 %977  ;;  %v976_v28 = vpop.permute.xlu0 %975  ;;  %v1636_v18 = vmul.f32 %v2777_v44, %v1628_v10 }
 0x3a0   : > { %v980_v30 = vsel %vm979_vm5, %v974_v53, %v976_v28  ;;  %v981_v58 = vsel %vm979_vm5, %v976_v28, %v978_v63 }
 0x3a1   : > { %v984_v36 = vsel %vm491_vm6, %v980_v30, 0.0  ;;  %v985_v55 = vsel %vm492_vm7, %v981_v58, 0.0  ;;  %v2776_v58 = vld [vmem:[#allocation10_spill] sm:$0xff] }
 0x3a2   : > { %v986_v38 = vadd.f32 %v984_v36, %v830_v6  ;;  %v987_v33 = vadd.f32 %v985_v55, %v831_v4  ;;  %v1634_v42 = vmul.f32 %v2776_v58, %v1626_v12  ;;  %v1635_v36 = vmul.f32 %v2776_v58, %v1627_v23 }
 0x3a3   : > { %v1637_v55 = vmul.f32 %v2777_v44, %v1629_v39 }
 0x3a7   : > { %v1132_v21 = vpop.permute.xlu1 %1131  ;;  %v1130_v15 = vpop.permute.xlu0 %1129 }
 0x3a8   : > { %v1136_v45 = vsel %vm1135_vm8, %v1130_v15, %v1132_v21 }
 0x3a9   : > { %v1140_v3 = vadd.f32 %v1136_v45, %v986_v38 }
 0x3ab   : > { %v1284_v62 = vpop.permute.xlu1 %1283  ;;  %v1134_v20 = vpop.permute.xlu0 %1133 }
 0x3ac   : > { %v1137_v54 = vsel %vm1135_vm8, %v1132_v21, %v1134_v20  ;;  %v1622_v20 = vld [vmem:[%s2011_s30] sm:$0xff] }
 0x3ad   : > { %v1141_v37 = vadd.f32 %v1137_v54, %v987_v33  ;;  %v1630_v30 = vmul.f32 %v2775_v14, %v1622_v20 }
 0x3af   : > { %v1288_v7 = vpop.permute.xlu1 %1287  ;;  %v1286_v43 = vpop.permute.xlu0 %1285 }
 0x3b0   : > { %v1290_v27 = vsel %vm1289_vm9, %v1284_v62, %v1286_v43  ;;  %v1291_v17 = vsel %vm1289_vm9, %v1286_v43, %v1288_v7  ;;  %v1625_v62 = vld [vmem:[%s2011_s30 + $0x18] sm:$0xff] }
 0x3b1   : > { %v1294_v1 = vsel %vm501_vm10, %v1290_v27, 0.0  ;;  %v1295_v8 = vsel %vm502_vm11, %v1291_v17, 0.0  ;;  %v1633_v7 = vmul.f32 %v2774_v35, %v1625_v62 }
 0x3b2   : > { %v1296_v59 = vadd.f32 %v1294_v1, %v1140_v3  ;;  %v1297_v24 = vadd.f32 %v1295_v8, %v1141_v37 }
 0x3b3   : > { %v1442_v5 = vpop.permute.xlu1 %1441  ;;  %v1440_v57 = vpop.permute.xlu0 %1439 }
 0x3b4   : > { %v1446_v25 = vsel %vm1445_vm13, %v1440_v57, %v1442_v5 }
 0x3b5   : > { %v1450_v13 = vsel %vm509_vm12, %v1446_v25, 0.0 }
 0x3b6   : > { %v1452_v53 = vadd.f32 %v1450_v13, %v1296_v59 }
 0x3b7   : > { %v1596_v48 = vpop.permute.xlu1 %1595  ;;  %v1444_v26 = vpop.permute.xlu0 %1443 }
 0x3b8   : > { %v1447_v49 = vsel %vm1445_vm13, %v1442_v5, %v1444_v26 }
 0x3b9   : > { %v1451_v41 = vsel %vm510_vm14, %v1447_v49, 0.0 }
 0x3ba   : > { %v1453_v2 = vadd.f32 %v1451_v41, %v1297_v24 }
 0x3bb   : > { %v1600_v56 = vpop.permute.xlu1 %1599  ;;  %v1598_v29 = vpop.permute.xlu0 %1597 }
 0x3bc   : > { %v1602_v50 = vsel %vm1601_vm15, %v1596_v48, %v1598_v29  ;;  %v1603_v63 = vsel %vm1601_vm15, %v1598_v29, %v1600_v56 }
 0x3bd   : > { %v1606_v28 = vsel %vm517_vm0, %v1602_v50, 0.0  ;;  %v1607_v32 = vsel %vm518_vm1, %v1603_v63, 0.0 }
 0x3be   : > { %v1608_v40 = vadd.f32 %v1606_v28, %v1452_v53  ;;  %v1609_v21 = vadd.f32 %v1607_v32, %v1453_v2 }
 0x3c0   : > { %v1841_v15 = vmul.f32 -1.442695, %v1608_v40  ;;  %v1842_v34 = vmul.f32 -1.442695, %v1609_v21 }
 0x3c2   : > { %1897 = vpow2.f32 %v1841_v15 }
 0x3c3   : > { %1899 = vpow2.f32 %v1842_v34 }
 0x3cc   : > { %v1898_v61 = vpop.eup %1897 }
 0x3cd   : > { %v1900_v9 = vpop.eup %1899  ;;  %v1616_v46 = vadd.f32 1.0, %v1898_v61 }
 0x3ce   : > { %v1617_v51 = vadd.f32 1.0, %v1900_v9 }
 0x3cf   : > { %1901 = vrcp.f32 %v1616_v46 }
 0x3d0   : > { %1903 = vrcp.f32 %v1617_v51 }
 0x3d9   : > { %v1902_v31 = vpop.eup %1901 }
 0x3da   : > { %v1904_v43 = vpop.eup %1903  ;;  %v1641_v60 = vrot.slane %v1902_v31, %v2608_v16 }
 0x3db   : > { %v1645_v5 = vrot.slane %v1904_v43, %v2608_v16 }
 0x3dc   : > { %v1646_v57 = vmul.f32 %v1641_v60, %v1630_v30  ;;  %v1648_v6 = vmul.f32 %v1641_v60, %v1632_v11  ;;  %v1650_v4 = vmul.f32 %v1641_v60, %v1634_v42  ;;  %v1652_v27 = vmul.f32 %v1641_v60, %v1636_v18 }
 0x3dd   : > { %v1647_v17 = vmul.f32 %v1645_v5, %v1631_v19  ;;  %v1649_v45 = vmul.f32 %v1645_v5, %v1633_v7  ;;  %v1651_v54 = vmul.f32 %v1645_v5, %v1635_v36  ;;  %v1653_v22 = vmul.f32 %v1645_v5, %v1637_v55 }
 0x3de   : > { %1654 = vst [vmem:[%s239_s27] sm:$0xff] %v1646_v57  ;;  %1656 = vst [vmem:[%s239_s27 + $0x10] sm:$0xff] %v1648_v6 }
 0x3df   : > { %1658 = vst [vmem:[%s239_s27 + $0x20] sm:$0xff] %v1650_v4  ;;  %1660 = vst [vmem:[%s239_s27 + $0x30] sm:$0xff] %v1652_v27 }
 0x3e0   : > { %1655 = vst [vmem:[%s239_s27 + $0x8] sm:$0xff] %v1647_v17  ;;  %1657 = vst [vmem:[%s239_s27 + $0x18] sm:$0xff] %v1649_v45 }
 0x3e1   : > { %1659 = vst [vmem:[%s239_s27 + $0x28] sm:$0xff] %v1651_v54  ;;  %1661 = vst [vmem:[%s239_s27 + $0x38] sm:$0xff] %v1653_v22 }
 0x3e2 PF: > { %s17_s20 = sadd.s32 1, %s1930_s20  }
 0x3e3   : > { %p14_p1 = scmp.ge.s32.totalorder %s17_s20, 4  }
 0x3e5   :  { %16 = sbr.rel (!%p14_p1) target bundleno = 3 (0x3), region = 76 }
 0x3ec   :  { %1683 = vsyncpa [#allocation5], 1 }
 0x3ed   :  { %1685 = vsyncpa [#allocation5 + $0x1], 1 }

</bundles_post_ra>
